<compile_context>
chip_gen: v6e
topology: v6e:2x2x1
jax: 0.10.0
libtpu: 0.0.40
codegen_flags: <defaults>
</compile_context>

<pallas_src>
import functools
import math

import jax
import jax.numpy as jnp
import numpy as np
from jax.experimental import pallas as pl
from jax.experimental.pallas import tpu as pltpu

EPS = 1e-5
# Scoped VMEM budget: well under v5e/v6e 128 MiB physical, leaves headroom on v7x 64 MiB.
_VMEM_LIMIT = 48 * 1024 * 1024


def _row_tile(rows: int, target: int = 512) -> int:
    """Largest row tile <= target that evenly divides `rows` (multiple of 8)."""
    if rows <= target:
        return rows
    for t in range(target, 7, -1):
        if rows % t == 0 and t % 8 == 0:
            return t
    return rows


# --------------------------------------------------------------------------- #
# Kernels
# --------------------------------------------------------------------------- #
def _attn_block_kernel(y_ref, kv_ref, sc_ref, sh_ref, wq_ref, wk_ref, wv_ref,
                       o_ref, st_ref, *, n_heads: int):
    """Per-batch-element block: y_norm = y*scale+shift; MHA(q=y_norm, kv=kv_raw);
    out = attn + y_norm; also emits per-block (col_sum, col_sumsq) for the next BN."""
    L, D = y_ref.shape[1], y_ref.shape[2]
    M = kv_ref.shape[1]
    H = n_heads
    hd = D // H
    inv_sqrt_d = 1.0 / math.sqrt(hd)

    # BN (affine pre-folded into scale/shift) applied to the query/residual stream.
    y = y_ref[0] * sc_ref[...] + sh_ref[...]          # (L, D) f32
    kv = kv_ref[0]                                    # (M, D) f32 (raw K/V source)

    yb = jnp.broadcast_to(y.astype(jnp.bfloat16)[None], (H, L, D))
    kb = jnp.broadcast_to(kv.astype(jnp.bfloat16)[None], (H, M, D))

    # Head-batched projections (weights pre-reshaped to (H, D, hd), bf16, resident).
    q = jnp.einsum('hld,hdk->hlk', yb, wq_ref[...],
                   preferred_element_type=jnp.float32)        # (H, L, hd)
    k = jnp.einsum('hmd,hdk->hmk', kb, wk_ref[...],
                   preferred_element_type=jnp.float32)        # (H, M, hd)
    v = jnp.einsum('hmd,hdk->hmk', kb, wv_ref[...],
                   preferred_element_type=jnp.float32)        # (H, M, hd)

    # Head-batched scores + softmax.  TODO(synk): flash-style KV tiling for long L.
    s = jnp.einsum('hlk,hmk->hlm', q.astype(jnp.bfloat16), k.astype(jnp.bfloat16),
                   preferred_element_type=jnp.float32) * inv_sqrt_d
    s = s - jnp.max(s, axis=-1, keepdims=True)
    p = jnp.exp(s)
    p = p * pl.reciprocal(jnp.sum(p, axis=-1, keepdims=True), approx=True)

    o = jnp.einsum('hlm,hmk->hlk', p.astype(jnp.bfloat16), v.astype(jnp.bfloat16),
                   preferred_element_type=jnp.float32)        # (H, L, hd)

    # Merge heads back to the lane-contiguous layout (cheap static lane concat).
    attn = jnp.concatenate([o[h] for h in range(H)], axis=-1)  # (L, D)

    out = attn + y                                             # residual (pre-BN)
    o_ref[...] = out[None]

    s1 = jnp.sum(out, axis=0, keepdims=True)
    s2 = jnp.sum(out * out, axis=0, keepdims=True)
    st_ref[...] = jnp.concatenate([s1, s2], axis=0)[None]      # (1, 2, D)


def _ffn_block_kernel(x_ref, sc_ref, sh_ref, w1_ref, b1_ref, w2_ref, b2_ref,
                      o_ref, st_ref):
    """Row tile: y = BN2(x); z = contract(relu(expand(y))) + y; emit BN3 stats."""
    y = x_ref[...] * sc_ref[...] + sh_ref[...]
    h = jnp.dot(y.astype(jnp.bfloat16), w1_ref[...],
                preferred_element_type=jnp.float32) + b1_ref[...]
    h = jnp.maximum(h, 0.0)                                    # activation = relu
    z = jnp.dot(h.astype(jnp.bfloat16), w2_ref[...],
                preferred_element_type=jnp.float32) + b2_ref[...]
    z = z + y
    o_ref[...] = z
    s1 = jnp.sum(z, axis=0, keepdims=True)
    s2 = jnp.sum(z * z, axis=0, keepdims=True)
    st_ref[...] = jnp.concatenate([s1, s2], axis=0)[None]


def _bn_apply_kernel(x_ref, sc_ref, sh_ref, o_ref):
    o_ref[...] = x_ref[...] * sc_ref[...] + sh_ref[...]


# --------------------------------------------------------------------------- #
# Pallas stage wrappers
# --------------------------------------------------------------------------- #
def _attention_stage(y, kv, scale, shift, wqh, wkh, wvh, *, n_heads):
    N, L, D = y.shape
    M = kv.shape[1]
    H = n_heads
    hd = D // H
    kernel = functools.partial(_attn_block_kernel, n_heads=H)
    blk3 = lambda n: (n, 0, 0)
    cst2 = lambda n: (0, 0)
    cst3 = lambda n: (0, 0, 0)
    return pl.pallas_call(
        kernel,
        grid=(N,),
        in_specs=[
            pl.BlockSpec((1, L, D), blk3),      # query / residual stream
            pl.BlockSpec((1, M, D), blk3),      # K/V source (self or encoded)
            pl.BlockSpec((1, D), cst2),         # BN scale (resident)
            pl.BlockSpec((1, D), cst2),         # BN shift (resident)
            pl.BlockSpec((H, D, hd), cst3),     # Wq (bf16, resident)
            pl.BlockSpec((H, D, hd), cst3),     # Wk
            pl.BlockSpec((H, D, hd), cst3),     # Wv
        ],
        out_specs=[
            pl.BlockSpec((1, L, D), blk3),
            pl.BlockSpec((1, 2, D), blk3),
        ],
        out_shape=[
            jax.ShapeDtypeStruct((N, L, D), jnp.float32),
            jax.ShapeDtypeStruct((N, 2, D), jnp.float32),
        ],
        compiler_params=pltpu.CompilerParams(
            dimension_semantics=("parallel",),
            vmem_limit_bytes=_VMEM_LIMIT),
    )(y, kv, scale, shift, wqh, wkh, wvh)


def _ffn_stage(x2d, scale, shift, w1b, b1, w2b, b2):
    R, D = x2d.shape
    Dff = w1b.shape[1]
    tm = _row_tile(R)
    G = R // tm
    cst = lambda i: (0, 0)
    return pl.pallas_call(
        _ffn_block_kernel,
        grid=(G,),
        in_specs=[
            pl.BlockSpec((tm, D), lambda i: (i, 0)),
            pl.BlockSpec((1, D), cst),
            pl.BlockSpec((1, D), cst),
            pl.BlockSpec((D, Dff), cst),        # expand weight (bf16, resident)
            pl.BlockSpec((1, Dff), cst),
            pl.BlockSpec((Dff, D), cst),        # contract weight (bf16, resident)
            pl.BlockSpec((1, D), cst),
        ],
        out_specs=[
            pl.BlockSpec((tm, D), lambda i: (i, 0)),
            pl.BlockSpec((1, 2, D), lambda i: (i, 0, 0)),
        ],
        out_shape=[
            jax.ShapeDtypeStruct((R, D), jnp.float32),
            jax.ShapeDtypeStruct((G, 2, D), jnp.float32),
        ],
        compiler_params=pltpu.CompilerParams(
            dimension_semantics=("parallel",),
            vmem_limit_bytes=_VMEM_LIMIT),
    )(x2d, scale, shift, w1b, b1, w2b, b2)


def _bn_apply_stage(x2d, scale, shift):
    R, D = x2d.shape
    tm = _row_tile(R)
    return pl.pallas_call(
        _bn_apply_kernel,
        grid=(R // tm,),
        in_specs=[
            pl.BlockSpec((tm, D), lambda i: (i, 0)),
            pl.BlockSpec((1, D), lambda i: (0, 0)),
            pl.BlockSpec((1, D), lambda i: (0, 0)),
        ],
        out_specs=pl.BlockSpec((tm, D), lambda i: (i, 0)),
        out_shape=jax.ShapeDtypeStruct((R, D), jnp.float32),
        compiler_params=pltpu.CompilerParams(
            dimension_semantics=("parallel",),
            vmem_limit_bytes=_VMEM_LIMIT),
    )(x2d, scale, shift)


def _bn_scale_shift(stats, count, gamma, beta):
    """Fold batch statistics (sum, sum_sq accumulated per grid block) + affine
    params into a single per-column (scale, shift) pair."""
    tot = jnp.sum(stats, axis=0)                  # (2, D)
    mean = tot[0] / count
    var = jnp.maximum(tot[1] / count - mean * mean, 0.0)
    inv = jax.lax.rsqrt(var + EPS)
    scale = gamma.reshape(-1) * inv
    shift = beta.reshape(-1) - mean * scale
    return scale.reshape(1, -1).astype(jnp.float32), shift.reshape(1, -1).astype(jnp.float32)


# --------------------------------------------------------------------------- #
# Full decoder-stage forward
# --------------------------------------------------------------------------- #
def transformer_decoder_stage(encoded, y, params, *, n_heads):
    """encoded, y: (N, L, D) float32.  Returns (N, L, D) float32."""
    (wq1, wk1, wv1, wq2, wk2, wv2, w1, b1, w2, b2,
     g1, be1, g2, be2, g3, be3) = params
    N, L, D = y.shape
    H = n_heads
    hd = D // H
    R = N * L

    def heads_bf16(w):  # (D, D) -> (H, D, hd), bf16 (done once, outside the kernels)
        return jnp.transpose(w.reshape(D, H, hd), (1, 0, 2)).astype(jnp.bfloat16)

    wq1h, wk1h, wv1h = heads_bf16(wq1), heads_bf16(wk1), heads_bf16(wv1)
    wq2h, wk2h, wv2h = heads_bf16(wq2), heads_bf16(wk2), heads_bf16(wv2)
    w1b = w1.astype(jnp.bfloat16)
    w2b = w2.astype(jnp.bfloat16)

    ones = jnp.ones((1, D), jnp.float32)
    zeros = jnp.zeros((1, D), jnp.float32)

    # Stage 1: masked self-attention on Y (+ residual with raw Y).
    # TODO(synk): dropout is identity (inference mode).
    out1, st1 = _attention_stage(y, y, ones, zeros, wq1h, wk1h, wv1h, n_heads=H)
    sc1, sh1 = _bn_scale_shift(st1, R, g1, be1)

    # Stage 2: first_norm applied, then cross-attention Q=Y_norm, K/V=encoded.
    out2, st2 = _attention_stage(out1, encoded, sc1, sh1, wq2h, wk2h, wv2h, n_heads=H)
    sc2, sh2 = _bn_scale_shift(st2, R, g2, be2)

    # Stage 3: second_norm applied, FFN expand->relu->contract, residual.
    out3, st3 = _ffn_stage(out2.reshape(R, D), sc2, sh2, w1b, b1, w2b, b2)
    sc3, sh3 = _bn_scale_shift(st3, R, g3, be3)

    # Stage 4: out_norm.
    out = _bn_apply_stage(out3, sc3, sh3)
    return out.reshape(N, L, D)


# --------------------------------------------------------------------------- #
# Pure-JAX reference (same precision policy: bf16 matmul operands, f32 accum)
# --------------------------------------------------------------------------- #
def reference_forward(encoded, y, params, *, n_heads):
    (wq1, wk1, wv1, wq2, wk2, wv2, w1, b1, w2, b2,
     g1, be1, g2, be2, g3, be3) = params
    N, L, D = y.shape
    H, hd = n_heads, D // n_heads

    def proj(x, w):
        return jnp.dot(x.astype(jnp.bfloat16), w.astype(jnp.bfloat16),
                       preferred_element_type=jnp.float32)

    def mha(xq, xkv, wq, wk, wv):
        q = proj(xq, wq).reshape(N, L, H, hd)
        k = proj(xkv, wk).reshape(N, L, H, hd)
        v = proj(xkv, wv).reshape(N, L, H, hd)
        s = jnp.einsum('nlhd,nmhd->nhlm', q.astype(jnp.bfloat16),
                       k.astype(jnp.bfloat16),
                       preferred_element_type=jnp.float32) / math.sqrt(hd)
        p = jax.nn.softmax(s, axis=-1)
        o = jnp.einsum('nhlm,nmhd->nlhd', p.astype(jnp.bfloat16),
                       v.astype(jnp.bfloat16),
                       preferred_element_type=jnp.float32)
        return o.reshape(N * L, D)

    def bn(t, g, b):
        m = jnp.mean(t, axis=0, keepdims=True)
        v = jnp.mean((t - m) ** 2, axis=0, keepdims=True)
        return (t - m) * jax.lax.rsqrt(v + EPS) * g + b

    yf = y.reshape(N * L, D)
    ef = encoded.reshape(N * L, D)

    inp = yf
    a1 = mha(yf, yf, wq1, wk1, wv1)
    y1 = bn(a1 + inp, g1, be1)

    inp = y1
    a2 = mha(y1, ef, wq2, wk2, wv2)
    y2 = bn(a2 + inp, g2, be2)

    inp = y2
    h = jax.nn.relu(proj(y2, w1) + b1)
    z = proj(h, w2) + b2
    y3 = bn(z + inp, g3, be3)
    return y3.reshape(N, L, D)


def make_params(key, projection_dim, n_heads):
    D = projection_dim * n_heads
    ks = jax.random.split(key, 10)

    def lin(k, fan_in, shape):
        return jax.random.normal(k, shape, jnp.float32) / math.sqrt(fan_in)

    # Bias-free Q/K/V projections for both attention blocks, stored transposed (in, out).
    wq1, wk1, wv1 = lin(ks[0], D, (D, D)), lin(ks[1], D, (D, D)), lin(ks[2], D, (D, D))
    wq2, wk2, wv2 = lin(ks[3], D, (D, D)), lin(ks[4], D, (D, D)), lin(ks[5], D, (D, D))
    # expand: Linear(D, 4D); contract: Linear(4D, D); stored transposed.
    w1 = lin(ks[6], D, (D, 4 * D))
    b1 = jax.random.normal(ks[7], (1, 4 * D), jnp.float32) * 0.01
    w2 = lin(ks[8], 4 * D, (4 * D, D))
    b2 = jax.random.normal(ks[9], (1, D), jnp.float32) * 0.01
    # BatchNorm1d affine params (torch defaults: weight=1, bias=0).
    g1, be1 = jnp.ones((1, D), jnp.float32), jnp.zeros((1, D), jnp.float32)
    g2, be2 = jnp.ones((1, D), jnp.float32), jnp.zeros((1, D), jnp.float32)
    g3, be3 = jnp.ones((1, D), jnp.float32), jnp.zeros((1, D), jnp.float32)
    return (wq1, wk1, wv1, wq2, wk2, wv2, w1, b1, w2, b2,
            g1, be1, g2, be2, g3, be3)


if __name__ == "__main__":
    # Small shapes consistent with the module's forward (N, L, F); F chosen = 128
    # so activations/outputs are lane-dense.
    N, L = 2, 16
    projection_dim, n_heads = 32, 4
    D = projection_dim * n_heads          # F = 128, FFN hidden = 512

    key = jax.random.PRNGKey(0)
    ke, ky, kp = jax.random.split(key, 3)
    encoded = jax.random.normal(ke, (N, L, D), jnp.float32)
    Y = jax.random.normal(ky, (N, L, D), jnp.float32)
    params = make_params(kp, projection_dim, n_heads)

    fwd = jax.jit(functools.partial(transformer_decoder_stage, n_heads=n_heads))
    out = jax.block_until_ready(fwd(encoded, Y, params))

    ref = reference_forward(encoded, Y, params, n_heads=n_heads)
    np.testing.assert_allclose(np.asarray(out), np.asarray(ref), atol=1e-2, rtol=1e-2)
    assert out.shape == (N, L, D)
    print("KERNEL_OK")
</pallas_src>

<mosaic_0001>
module attributes {stable_mosaic.version = 11 : i64} {
  func.func @_attn_block_kernel(%arg0: i32, %arg1: memref<1x16x128xf32, #tpu.memory_space<vmem>>, %arg2: memref<1x16x128xf32, #tpu.memory_space<vmem>>, %arg3: memref<1x128xf32, #tpu.memory_space<vmem>>, %arg4: memref<1x128xf32, #tpu.memory_space<vmem>>, %arg5: memref<4x128x32xbf16, #tpu.memory_space<vmem>>, %arg6: memref<4x128x32xbf16, #tpu.memory_space<vmem>>, %arg7: memref<4x128x32xbf16, #tpu.memory_space<vmem>>, %arg8: memref<1x16x128xf32, #tpu.memory_space<vmem>>, %arg9: memref<1x2x128xf32, #tpu.memory_space<vmem>>) attributes {dimension_semantics = [#tpu.dimension_semantics<parallel>], iteration_bounds = array<i64: 2>, scalar_prefetch = 0 : i64, scratch_operands = 0 : i64, tpu.core_type = #tpu.core_type<tc>, window_params = [{transform_indices = @transform_0, window_bounds = array<i64: 1, 16, 128>}, {transform_indices = @transform_1, window_bounds = array<i64: 1, 16, 128>}, {pipeline_mode = #tpu.pipeline_mode<synchronous>, transform_indices = @transform_2, window_bounds = array<i64: 1, 128>}, {pipeline_mode = #tpu.pipeline_mode<synchronous>, transform_indices = @transform_3, window_bounds = array<i64: 1, 128>}, {pipeline_mode = #tpu.pipeline_mode<synchronous>, transform_indices = @transform_4, window_bounds = array<i64: 4, 128, 32>}, {pipeline_mode = #tpu.pipeline_mode<synchronous>, transform_indices = @transform_5, window_bounds = array<i64: 4, 128, 32>}, {pipeline_mode = #tpu.pipeline_mode<synchronous>, transform_indices = @transform_6, window_bounds = array<i64: 4, 128, 32>}, {transform_indices = @transform_7, window_bounds = array<i64: 1, 16, 128>}, {transform_indices = @transform_8, window_bounds = array<i64: 1, 2, 128>}]} {
    %c0 = arith.constant 0 : index
    %c0_0 = arith.constant 0 : index
    %c0_1 = arith.constant 0 : index
    %0 = vector.load %arg1[%c0, %c0_0, %c0_1] : memref<1x16x128xf32, #tpu.memory_space<vmem>>, vector<1x16x128xf32>
    %1 = vector.shape_cast %0 : vector<1x16x128xf32> to vector<16x128xf32>
    %c0_2 = arith.constant 0 : index
    %c0_3 = arith.constant 0 : index
    %2 = vector.load %arg3[%c0_2, %c0_3] : memref<1x128xf32, #tpu.memory_space<vmem>>, vector<1x128xf32>
    %3 = vector.broadcast %2 : vector<1x128xf32> to vector<16x128xf32>
    %4 = arith.mulf %1, %3 : vector<16x128xf32>
    %c0_4 = arith.constant 0 : index
    %c0_5 = arith.constant 0 : index
    %5 = vector.load %arg4[%c0_4, %c0_5] : memref<1x128xf32, #tpu.memory_space<vmem>>, vector<1x128xf32>
    %6 = vector.broadcast %5 : vector<1x128xf32> to vector<16x128xf32>
    %7 = arith.addf %4, %6 : vector<16x128xf32>
    %c0_6 = arith.constant 0 : index
    %c0_7 = arith.constant 0 : index
    %c0_8 = arith.constant 0 : index
    %8 = vector.load %arg2[%c0_6, %c0_7, %c0_8] : memref<1x16x128xf32, #tpu.memory_space<vmem>>, vector<1x16x128xf32>
    %9 = vector.shape_cast %8 : vector<1x16x128xf32> to vector<16x128xf32>
    %10 = arith.truncf %7 : vector<16x128xf32> to vector<16x128xbf16>
    %11 = vector.shape_cast %10 : vector<16x128xbf16> to vector<1x16x128xbf16>
    %12 = vector.shape_cast %11 : vector<1x16x128xbf16> to vector<1x16x128xbf16>
    %13 = vector.broadcast %12 : vector<1x16x128xbf16> to vector<4x16x128xbf16>
    %14 = arith.truncf %9 : vector<16x128xf32> to vector<16x128xbf16>
    %15 = vector.shape_cast %14 : vector<16x128xbf16> to vector<1x16x128xbf16>
    %16 = vector.shape_cast %15 : vector<1x16x128xbf16> to vector<1x16x128xbf16>
    %17 = vector.broadcast %16 : vector<1x16x128xbf16> to vector<4x16x128xbf16>
    %c0_9 = arith.constant 0 : index
    %c0_10 = arith.constant 0 : index
    %c0_11 = arith.constant 0 : index
    %18 = vector.load %arg5[%c0_9, %c0_10, %c0_11] : memref<4x128x32xbf16, #tpu.memory_space<vmem>>, vector<4x128x32xbf16>
    "tpu.trace_start"() <{level = 10 : i32, message = "hld,hdk->hlk"}> : () -> ()
    %cst = arith.constant dense<0.000000e+00> : vector<4x16x32xf32>
    %19 = tpu.matmul %13, %18, %cst {dimension_numbers = #tpu.dot_dimension_numbers<[2], [1], [1], [2], [0, 0, 0, 1, 1, 2], [0], [0]>} : vector<4x16x128xbf16>, vector<4x128x32xbf16>, vector<4x16x32xf32> -> vector<4x16x32xf32>
    "tpu.trace_stop"() : () -> ()
    %c0_12 = arith.constant 0 : index
    %c0_13 = arith.constant 0 : index
    %c0_14 = arith.constant 0 : index
    %20 = vector.load %arg6[%c0_12, %c0_13, %c0_14] : memref<4x128x32xbf16, #tpu.memory_space<vmem>>, vector<4x128x32xbf16>
    "tpu.trace_start"() <{level = 10 : i32, message = "hmd,hdk->hmk"}> : () -> ()
    %cst_15 = arith.constant dense<0.000000e+00> : vector<4x16x32xf32>
    %21 = tpu.matmul %17, %20, %cst_15 {dimension_numbers = #tpu.dot_dimension_numbers<[2], [1], [1], [2], [0, 0, 0, 1, 1, 2], [0], [0]>} : vector<4x16x128xbf16>, vector<4x128x32xbf16>, vector<4x16x32xf32> -> vector<4x16x32xf32>
    "tpu.trace_stop"() : () -> ()
    %c0_16 = arith.constant 0 : index
    %c0_17 = arith.constant 0 : index
    %c0_18 = arith.constant 0 : index
    %22 = vector.load %arg7[%c0_16, %c0_17, %c0_18] : memref<4x128x32xbf16, #tpu.memory_space<vmem>>, vector<4x128x32xbf16>
    "tpu.trace_start"() <{level = 10 : i32, message = "hmd,hdk->hmk"}> : () -> ()
    %cst_19 = arith.constant dense<0.000000e+00> : vector<4x16x32xf32>
    %23 = tpu.matmul %17, %22, %cst_19 {dimension_numbers = #tpu.dot_dimension_numbers<[2], [1], [1], [2], [0, 0, 0, 1, 1, 2], [0], [0]>} : vector<4x16x128xbf16>, vector<4x128x32xbf16>, vector<4x16x32xf32> -> vector<4x16x32xf32>
    "tpu.trace_stop"() : () -> ()
    %24 = arith.truncf %19 : vector<4x16x32xf32> to vector<4x16x32xbf16>
    %25 = arith.truncf %21 : vector<4x16x32xf32> to vector<4x16x32xbf16>
    "tpu.trace_start"() <{level = 10 : i32, message = "hlk,hmk->hlm"}> : () -> ()
    %cst_20 = arith.constant dense<0.000000e+00> : vector<4x16x16xf32>
    %26 = tpu.matmul %24, %25, %cst_20 {dimension_numbers = #tpu.dot_dimension_numbers<[2], [2], [1], [1], [0, 0, 0, 1, 1, 1], [0], [0]>} : vector<4x16x32xbf16>, vector<4x16x32xbf16>, vector<4x16x16xf32> -> vector<4x16x16xf32>
    "tpu.trace_stop"() : () -> ()
    %cst_21 = arith.constant 0.176776692 : f32
    %27 = vector.broadcast %cst_21 : f32 to vector<4x16x16xf32>
    %28 = arith.mulf %26, %27 : vector<4x16x16xf32>
    %cst_22 = arith.constant dense<0xFF800000> : vector<4x16xf32>
    %29 = vector.multi_reduction <maximumf>, %28, %cst_22 [2] : vector<4x16x16xf32> to vector<4x16xf32>
    %30 = vector.shape_cast %29 : vector<4x16xf32> to vector<4x16x1xf32>
    %31 = vector.broadcast %30 : vector<4x16x1xf32> to vector<4x16x16xf32>
    %32 = arith.subf %28, %31 : vector<4x16x16xf32>
    %33 = math.exp %32 : vector<4x16x16xf32>
    %cst_23 = arith.constant dense<0.000000e+00> : vector<4x16xf32>
    %34 = vector.multi_reduction <add>, %33, %cst_23 [2] : vector<4x16x16xf32> to vector<4x16xf32>
    %35 = vector.shape_cast %34 : vector<4x16xf32> to vector<4x16x1xf32>
    %36 = tpu.reciprocal %35 {approx = true} : vector<4x16x1xf32> -> vector<4x16x1xf32>
    %37 = vector.broadcast %36 : vector<4x16x1xf32> to vector<4x16x16xf32>
    %38 = arith.mulf %33, %37 : vector<4x16x16xf32>
    %39 = arith.truncf %38 : vector<4x16x16xf32> to vector<4x16x16xbf16>
    %40 = arith.truncf %23 : vector<4x16x32xf32> to vector<4x16x32xbf16>
    "tpu.trace_start"() <{level = 10 : i32, message = "hlm,hmk->hlk"}> : () -> ()
    %cst_24 = arith.constant dense<0.000000e+00> : vector<4x16x32xf32>
    %41 = tpu.matmul %39, %40, %cst_24 {dimension_numbers = #tpu.dot_dimension_numbers<[2], [1], [1], [2], [0, 0, 0, 1, 1, 2], [0], [0]>} : vector<4x16x16xbf16>, vector<4x16x32xbf16>, vector<4x16x32xf32> -> vector<4x16x32xf32>
    "tpu.trace_stop"() : () -> ()
    %42 = vector.extract_strided_slice %41 {offsets = [0, 0, 0], sizes = [1, 16, 32], strides = [1, 1, 1]} : vector<4x16x32xf32> to vector<1x16x32xf32>
    %43 = vector.shape_cast %42 : vector<1x16x32xf32> to vector<16x32xf32>
    %44 = vector.extract_strided_slice %41 {offsets = [1, 0, 0], sizes = [1, 16, 32], strides = [1, 1, 1]} : vector<4x16x32xf32> to vector<1x16x32xf32>
    %45 = vector.shape_cast %44 : vector<1x16x32xf32> to vector<16x32xf32>
    %46 = vector.extract_strided_slice %41 {offsets = [2, 0, 0], sizes = [1, 16, 32], strides = [1, 1, 1]} : vector<4x16x32xf32> to vector<1x16x32xf32>
    %47 = vector.shape_cast %46 : vector<1x16x32xf32> to vector<16x32xf32>
    %48 = vector.extract_strided_slice %41 {offsets = [3, 0, 0], sizes = [1, 16, 32], strides = [1, 1, 1]} : vector<4x16x32xf32> to vector<1x16x32xf32>
    %49 = vector.shape_cast %48 : vector<1x16x32xf32> to vector<16x32xf32>
    %50 = tpu.concatenate %43, %45, %47, %49 in 1 : vector<16x32xf32>, vector<16x32xf32>, vector<16x32xf32>, vector<16x32xf32> -> vector<16x128xf32>
    %51 = arith.addf %50, %7 : vector<16x128xf32>
    %52 = vector.shape_cast %51 : vector<16x128xf32> to vector<1x16x128xf32>
    %c0_25 = arith.constant 0 : index
    %c0_26 = arith.constant 0 : index
    %c0_27 = arith.constant 0 : index
    %53 = vector.load %arg8[%c0_25, %c0_26, %c0_27] : memref<1x16x128xf32, #tpu.memory_space<vmem>>, vector<1x16x128xf32>
    tpu.vector_store %arg8[%c0_25, %c0_26, %c0_27], %52 {strides = array<i32>} : memref<1x16x128xf32, #tpu.memory_space<vmem>>, vector<1x16x128xf32>,
    %cst_28 = arith.constant dense<0.000000e+00> : vector<128xf32>
    %54 = vector.multi_reduction <add>, %51, %cst_28 [0] : vector<16x128xf32> to vector<128xf32>
    %55 = vector.shape_cast %54 : vector<128xf32> to vector<1x128xf32>
    %56 = arith.mulf %51, %51 : vector<16x128xf32>
    %cst_29 = arith.constant dense<0.000000e+00> : vector<128xf32>
    %57 = vector.multi_reduction <add>, %56, %cst_29 [0] : vector<16x128xf32> to vector<128xf32>
    %58 = vector.shape_cast %57 : vector<128xf32> to vector<1x128xf32>
    %59 = tpu.concatenate %55, %58 in 0 : vector<1x128xf32>, vector<1x128xf32> -> vector<2x128xf32>
    %60 = vector.shape_cast %59 : vector<2x128xf32> to vector<1x2x128xf32>
    %c0_30 = arith.constant 0 : index
    %c0_31 = arith.constant 0 : index
    %c0_32 = arith.constant 0 : index
    %61 = vector.load %arg9[%c0_30, %c0_31, %c0_32] : memref<1x2x128xf32, #tpu.memory_space<vmem>>, vector<1x2x128xf32>
    tpu.vector_store %arg9[%c0_30, %c0_31, %c0_32], %60 {strides = array<i32>} : memref<1x2x128xf32, #tpu.memory_space<vmem>>, vector<1x2x128xf32>,
    return
  }
  func.func @transform_0(%arg0: i32) -> (i32, i32, i32) {
    %c0_i32 = arith.constant 0 : i32
    %c0_i32_0 = arith.constant 0 : i32
    %c0_i32_1 = arith.constant 0 : i32
    return %arg0, %c0_i32, %c0_i32_0 : i32, i32, i32
  }
  func.func @transform_1(%arg0: i32) -> (i32, i32, i32) {
    %c0_i32 = arith.constant 0 : i32
    %c0_i32_0 = arith.constant 0 : i32
    %c0_i32_1 = arith.constant 0 : i32
    return %arg0, %c0_i32, %c0_i32_0 : i32, i32, i32
  }
  func.func @transform_2(%arg0: i32) -> (i32, i32) {
    %c0_i32 = arith.constant 0 : i32
    %c0_i32_0 = arith.constant 0 : i32
    %c0_i32_1 = arith.constant 0 : i32
    return %c0_i32, %c0_i32_0 : i32, i32
  }
  func.func @transform_3(%arg0: i32) -> (i32, i32) {
    %c0_i32 = arith.constant 0 : i32
    %c0_i32_0 = arith.constant 0 : i32
    %c0_i32_1 = arith.constant 0 : i32
    return %c0_i32, %c0_i32_0 : i32, i32
  }
  func.func @transform_4(%arg0: i32) -> (i32, i32, i32) {
    %c0_i32 = arith.constant 0 : i32
    %c0_i32_0 = arith.constant 0 : i32
    %c0_i32_1 = arith.constant 0 : i32
    %c0_i32_2 = arith.constant 0 : i32
    return %c0_i32, %c0_i32_0, %c0_i32_1 : i32, i32, i32
  }
  func.func @transform_5(%arg0: i32) -> (i32, i32, i32) {
    %c0_i32 = arith.constant 0 : i32
    %c0_i32_0 = arith.constant 0 : i32
    %c0_i32_1 = arith.constant 0 : i32
    %c0_i32_2 = arith.constant 0 : i32
    return %c0_i32, %c0_i32_0, %c0_i32_1 : i32, i32, i32
  }
  func.func @transform_6(%arg0: i32) -> (i32, i32, i32) {
    %c0_i32 = arith.constant 0 : i32
    %c0_i32_0 = arith.constant 0 : i32
    %c0_i32_1 = arith.constant 0 : i32
    %c0_i32_2 = arith.constant 0 : i32
    return %c0_i32, %c0_i32_0, %c0_i32_1 : i32, i32, i32
  }
  func.func @transform_7(%arg0: i32) -> (i32, i32, i32) {
    %c0_i32 = arith.constant 0 : i32
    %c0_i32_0 = arith.constant 0 : i32
    %c0_i32_1 = arith.constant 0 : i32
    return %arg0, %c0_i32, %c0_i32_0 : i32, i32, i32
  }
  func.func @transform_8(%arg0: i32) -> (i32, i32, i32) {
    %c0_i32 = arith.constant 0 : i32
    %c0_i32_0 = arith.constant 0 : i32
    %c0_i32_1 = arith.constant 0 : i32
    return %arg0, %c0_i32, %c0_i32_0 : i32, i32, i32
  }
}

module attributes {stable_mosaic.version = 11 : i64} {
  func.func @_ffn_block_kernel(%arg0: i32, %arg1: memref<32x128xf32, #tpu.memory_space<vmem>>, %arg2: memref<1x128xf32, #tpu.memory_space<vmem>>, %arg3: memref<1x128xf32, #tpu.memory_space<vmem>>, %arg4: memref<128x512xbf16, #tpu.memory_space<vmem>>, %arg5: memref<1x512xf32, #tpu.memory_space<vmem>>, %arg6: memref<512x128xbf16, #tpu.memory_space<vmem>>, %arg7: memref<1x128xf32, #tpu.memory_space<vmem>>, %arg8: memref<32x128xf32, #tpu.memory_space<vmem>>, %arg9: memref<1x2x128xf32, #tpu.memory_space<vmem>>) attributes {dimension_semantics = [#tpu.dimension_semantics<parallel>], iteration_bounds = array<i64: 1>, scalar_prefetch = 0 : i64, scratch_operands = 0 : i64, tpu.core_type = #tpu.core_type<tc>, window_params = [{transform_indices = @transform_0, window_bounds = array<i64: 32, 128>}, {pipeline_mode = #tpu.pipeline_mode<synchronous>, transform_indices = @transform_1, window_bounds = array<i64: 1, 128>}, {pipeline_mode = #tpu.pipeline_mode<synchronous>, transform_indices = @transform_2, window_bounds = array<i64: 1, 128>}, {pipeline_mode = #tpu.pipeline_mode<synchronous>, transform_indices = @transform_3, window_bounds = array<i64: 128, 512>}, {pipeline_mode = #tpu.pipeline_mode<synchronous>, transform_indices = @transform_4, window_bounds = array<i64: 1, 512>}, {pipeline_mode = #tpu.pipeline_mode<synchronous>, transform_indices = @transform_5, window_bounds = array<i64: 512, 128>}, {pipeline_mode = #tpu.pipeline_mode<synchronous>, transform_indices = @transform_6, window_bounds = array<i64: 1, 128>}, {transform_indices = @transform_7, window_bounds = array<i64: 32, 128>}, {transform_indices = @transform_8, window_bounds = array<i64: 1, 2, 128>}]} {
    %c0 = arith.constant 0 : index
    %c0_0 = arith.constant 0 : index
    %0 = vector.load %arg1[%c0, %c0_0] : memref<32x128xf32, #tpu.memory_space<vmem>>, vector<32x128xf32>
    %c0_1 = arith.constant 0 : index
    %c0_2 = arith.constant 0 : index
    %1 = vector.load %arg2[%c0_1, %c0_2] : memref<1x128xf32, #tpu.memory_space<vmem>>, vector<1x128xf32>
    %2 = vector.broadcast %1 : vector<1x128xf32> to vector<32x128xf32>
    %3 = arith.mulf %0, %2 : vector<32x128xf32>
    %c0_3 = arith.constant 0 : index
    %c0_4 = arith.constant 0 : index
    %4 = vector.load %arg3[%c0_3, %c0_4] : memref<1x128xf32, #tpu.memory_space<vmem>>, vector<1x128xf32>
    %5 = vector.broadcast %4 : vector<1x128xf32> to vector<32x128xf32>
    %6 = arith.addf %3, %5 : vector<32x128xf32>
    %7 = arith.truncf %6 : vector<32x128xf32> to vector<32x128xbf16>
    %c0_5 = arith.constant 0 : index
    %c0_6 = arith.constant 0 : index
    %8 = vector.load %arg4[%c0_5, %c0_6] : memref<128x512xbf16, #tpu.memory_space<vmem>>, vector<128x512xbf16>
    %cst = arith.constant dense<0.000000e+00> : vector<32x512xf32>
    %9 = tpu.matmul %7, %8, %cst {dimension_numbers = #tpu.dot_dimension_numbers<[1], [0], [0], [1], [0, 0, 1, 1], [], []>} : vector<32x128xbf16>, vector<128x512xbf16>, vector<32x512xf32> -> vector<32x512xf32>
    %c0_7 = arith.constant 0 : index
    %c0_8 = arith.constant 0 : index
    %10 = vector.load %arg5[%c0_7, %c0_8] : memref<1x512xf32, #tpu.memory_space<vmem>>, vector<1x512xf32>
    %11 = vector.broadcast %10 : vector<1x512xf32> to vector<32x512xf32>
    %12 = arith.addf %9, %11 : vector<32x512xf32>
    %cst_9 = arith.constant 0.000000e+00 : f32
    %13 = vector.broadcast %cst_9 : f32 to vector<32x512xf32>
    %14 = arith.maximumf %12, %13 : vector<32x512xf32>
    %15 = arith.truncf %14 : vector<32x512xf32> to vector<32x512xbf16>
    %c0_10 = arith.constant 0 : index
    %c0_11 = arith.constant 0 : index
    %16 = vector.load %arg6[%c0_10, %c0_11] : memref<512x128xbf16, #tpu.memory_space<vmem>>, vector<512x128xbf16>
    %cst_12 = arith.constant dense<0.000000e+00> : vector<32x128xf32>
    %17 = tpu.matmul %15, %16, %cst_12 {dimension_numbers = #tpu.dot_dimension_numbers<[1], [0], [0], [1], [0, 0, 1, 1], [], []>} : vector<32x512xbf16>, vector<512x128xbf16>, vector<32x128xf32> -> vector<32x128xf32>
    %c0_13 = arith.constant 0 : index
    %c0_14 = arith.constant 0 : index
    %18 = vector.load %arg7[%c0_13, %c0_14] : memref<1x128xf32, #tpu.memory_space<vmem>>, vector<1x128xf32>
    %19 = vector.broadcast %18 : vector<1x128xf32> to vector<32x128xf32>
    %20 = arith.addf %17, %19 : vector<32x128xf32>
    %21 = arith.addf %20, %6 : vector<32x128xf32>
    %c0_15 = arith.constant 0 : index
    %c0_16 = arith.constant 0 : index
    %22 = vector.load %arg8[%c0_15, %c0_16] : memref<32x128xf32, #tpu.memory_space<vmem>>, vector<32x128xf32>
    tpu.vector_store %arg8[%c0_15, %c0_16], %21 {strides = array<i32>} : memref<32x128xf32, #tpu.memory_space<vmem>>, vector<32x128xf32>,
    %cst_17 = arith.constant dense<0.000000e+00> : vector<128xf32>
    %23 = vector.multi_reduction <add>, %21, %cst_17 [0] : vector<32x128xf32> to vector<128xf32>
    %24 = vector.shape_cast %23 : vector<128xf32> to vector<1x128xf32>
    %25 = arith.mulf %21, %21 : vector<32x128xf32>
    %cst_18 = arith.constant dense<0.000000e+00> : vector<128xf32>
    %26 = vector.multi_reduction <add>, %25, %cst_18 [0] : vector<32x128xf32> to vector<128xf32>
    %27 = vector.shape_cast %26 : vector<128xf32> to vector<1x128xf32>
    %28 = tpu.concatenate %24, %27 in 0 : vector<1x128xf32>, vector<1x128xf32> -> vector<2x128xf32>
    %29 = vector.shape_cast %28 : vector<2x128xf32> to vector<1x2x128xf32>
    %c0_19 = arith.constant 0 : index
    %c0_20 = arith.constant 0 : index
    %c0_21 = arith.constant 0 : index
    %30 = vector.load %arg9[%c0_19, %c0_20, %c0_21] : memref<1x2x128xf32, #tpu.memory_space<vmem>>, vector<1x2x128xf32>
    tpu.vector_store %arg9[%c0_19, %c0_20, %c0_21], %29 {strides = array<i32>} : memref<1x2x128xf32, #tpu.memory_space<vmem>>, vector<1x2x128xf32>,
    return
  }
  func.func @transform_0(%arg0: i32) -> (i32, i32) {
    %c0_i32 = arith.constant 0 : i32
    %c0_i32_0 = arith.constant 0 : i32
    return %arg0, %c0_i32 : i32, i32
  }
  func.func @transform_1(%arg0: i32) -> (i32, i32) {
    %c0_i32 = arith.constant 0 : i32
    %c0_i32_0 = arith.constant 0 : i32
    %c0_i32_1 = arith.constant 0 : i32
    return %c0_i32, %c0_i32_0 : i32, i32
  }
  func.func @transform_2(%arg0: i32) -> (i32, i32) {
    %c0_i32 = arith.constant 0 : i32
    %c0_i32_0 = arith.constant 0 : i32
    %c0_i32_1 = arith.constant 0 : i32
    return %c0_i32, %c0_i32_0 : i32, i32
  }
  func.func @transform_3(%arg0: i32) -> (i32, i32) {
    %c0_i32 = arith.constant 0 : i32
    %c0_i32_0 = arith.constant 0 : i32
    %c0_i32_1 = arith.constant 0 : i32
    return %c0_i32, %c0_i32_0 : i32, i32
  }
  func.func @transform_4(%arg0: i32) -> (i32, i32) {
    %c0_i32 = arith.constant 0 : i32
    %c0_i32_0 = arith.constant 0 : i32
    %c0_i32_1 = arith.constant 0 : i32
    return %c0_i32, %c0_i32_0 : i32, i32
  }
  func.func @transform_5(%arg0: i32) -> (i32, i32) {
    %c0_i32 = arith.constant 0 : i32
    %c0_i32_0 = arith.constant 0 : i32
    %c0_i32_1 = arith.constant 0 : i32
    return %c0_i32, %c0_i32_0 : i32, i32
  }
  func.func @transform_6(%arg0: i32) -> (i32, i32) {
    %c0_i32 = arith.constant 0 : i32
    %c0_i32_0 = arith.constant 0 : i32
    %c0_i32_1 = arith.constant 0 : i32
    return %c0_i32, %c0_i32_0 : i32, i32
  }
  func.func @transform_7(%arg0: i32) -> (i32, i32) {
    %c0_i32 = arith.constant 0 : i32
    %c0_i32_0 = arith.constant 0 : i32
    return %arg0, %c0_i32 : i32, i32
  }
  func.func @transform_8(%arg0: i32) -> (i32, i32, i32) {
    %c0_i32 = arith.constant 0 : i32
    %c0_i32_0 = arith.constant 0 : i32
    %c0_i32_1 = arith.constant 0 : i32
    return %arg0, %c0_i32, %c0_i32_0 : i32, i32, i32
  }
}

module attributes {stable_mosaic.version = 11 : i64} {
  func.func @_bn_apply_kernel(%arg0: i32, %arg1: memref<32x128xf32, #tpu.memory_space<vmem>>, %arg2: memref<1x128xf32, #tpu.memory_space<vmem>>, %arg3: memref<1x128xf32, #tpu.memory_space<vmem>>, %arg4: memref<32x128xf32, #tpu.memory_space<vmem>>) attributes {dimension_semantics = [#tpu.dimension_semantics<parallel>], iteration_bounds = array<i64: 1>, scalar_prefetch = 0 : i64, scratch_operands = 0 : i64, tpu.core_type = #tpu.core_type<tc>, window_params = [{transform_indices = @transform_0, window_bounds = array<i64: 32, 128>}, {pipeline_mode = #tpu.pipeline_mode<synchronous>, transform_indices = @transform_1, window_bounds = array<i64: 1, 128>}, {pipeline_mode = #tpu.pipeline_mode<synchronous>, transform_indices = @transform_2, window_bounds = array<i64: 1, 128>}, {transform_indices = @transform_3, window_bounds = array<i64: 32, 128>}]} {
    %c0 = arith.constant 0 : index
    %c0_0 = arith.constant 0 : index
    %0 = vector.load %arg1[%c0, %c0_0] : memref<32x128xf32, #tpu.memory_space<vmem>>, vector<32x128xf32>
    %c0_1 = arith.constant 0 : index
    %c0_2 = arith.constant 0 : index
    %1 = vector.load %arg2[%c0_1, %c0_2] : memref<1x128xf32, #tpu.memory_space<vmem>>, vector<1x128xf32>
    %2 = vector.broadcast %1 : vector<1x128xf32> to vector<32x128xf32>
    %3 = arith.mulf %0, %2 : vector<32x128xf32>
    %c0_3 = arith.constant 0 : index
    %c0_4 = arith.constant 0 : index
    %4 = vector.load %arg3[%c0_3, %c0_4] : memref<1x128xf32, #tpu.memory_space<vmem>>, vector<1x128xf32>
    %5 = vector.broadcast %4 : vector<1x128xf32> to vector<32x128xf32>
    %6 = arith.addf %3, %5 : vector<32x128xf32>
    %c0_5 = arith.constant 0 : index
    %c0_6 = arith.constant 0 : index
    %7 = vector.load %arg4[%c0_5, %c0_6] : memref<32x128xf32, #tpu.memory_space<vmem>>, vector<32x128xf32>
    tpu.vector_store %arg4[%c0_5, %c0_6], %6 {strides = array<i32>} : memref<32x128xf32, #tpu.memory_space<vmem>>, vector<32x128xf32>,
    return
  }
  func.func @transform_0(%arg0: i32) -> (i32, i32) {
    %c0_i32 = arith.constant 0 : i32
    %c0_i32_0 = arith.constant 0 : i32
    return %arg0, %c0_i32 : i32, i32
  }
  func.func @transform_1(%arg0: i32) -> (i32, i32) {
    %c0_i32 = arith.constant 0 : i32
    %c0_i32_0 = arith.constant 0 : i32
    %c0_i32_1 = arith.constant 0 : i32
    return %c0_i32, %c0_i32_0 : i32, i32
  }
  func.func @transform_2(%arg0: i32) -> (i32, i32) {
    %c0_i32 = arith.constant 0 : i32
    %c0_i32_0 = arith.constant 0 : i32
    %c0_i32_1 = arith.constant 0 : i32
    return %c0_i32, %c0_i32_0 : i32, i32
  }
  func.func @transform_3(%arg0: i32) -> (i32, i32) {
    %c0_i32 = arith.constant 0 : i32
    %c0_i32_0 = arith.constant 0 : i32
    return %arg0, %c0_i32 : i32, i32
  }
}

</mosaic_0001>

<bundles_post_ra>
// kernel: transformer_decoder_stage.7
= control target key start
LH: loop header
LB: loop body
LE: loop exit
PB: predicated region body
PF: predicated region fallthrough
CT: control target
= control target key end

     0   :  { %s88_s24 = smov [#allocation2]   ;;  %s132_s0 = inlined_call_operand.vmem [shape: f32[32,128], index: 0, kind: input, shape index: {}]   ;;  %s133_s1 = inlined_call_operand.vmem [shape: f32[1,128], index: 1, kind: input, shape index: {}]   ;;  %s134_s2 = inlined_call_operand.vmem [shape: f32[1,128], index: 2, kind: input, shape index: {}]   ;;  %s135_s3 = inlined_call_operand.hbm [shape: f32[32,128], index: 3, kind: output, shape index: {}]  }
   0x1   :  { %v15_v0 = vld [vmem:[%s132_s0] sm:$0xff]  ;;  %v16_v4 = vld [vmem:[%s132_s0 + $0x8] sm:$0xff]  ;;  %v17_v5 = vld [vmem:[%s132_s0 + $0x10] sm:$0xff]  ;;  %s50_s25 = sshll.u32 %s88_s24, 4  ;;  %s51_s25 = int_to_ptr.vmem [resolvable:$true] %s50_s25 }
   0x2   :  { %v61_v1 = vld [vmem:[%s133_s1] ss:$0 sm:$0xff]  ;;  %v18_v6 = vld [vmem:[%s132_s0 + $0x18] sm:$0xff] }
   0x3   :  { %v62_v2 = vld [vmem:[%s134_s2] ss:$0 sm:$0xff]  ;;  %v26_v3 = vmul.f32 %v61_v1, %v15_v0  ;;  %v27_v7 = vmul.f32 %v61_v1, %v16_v4  ;;  %v28_v8 = vmul.f32 %v61_v1, %v17_v5  ;;  %v29_v9 = vmul.f32 %v61_v1, %v18_v6 }
   0x4   :  { %8 = vsyncpa [#allocation3], 0  ;;  %s66_s1 = scalar_lea.vmem %s51_s25, 512  ;;  %p71_p1 = scmp.lt.s32.totalorder %s51_s25, %s51_s25 }
   0x5   :  { %v37_v10 = vadd.f32 %v62_v2, %v26_v3  ;;  %v38_v11 = vadd.f32 %v62_v2, %v27_v7  ;;  %v39_v12 = vadd.f32 %v62_v2, %v28_v8  ;;  %v40_v13 = vadd.f32 %v62_v2, %v29_v9  ;;  %p67_p0 = scmp.ne.s32.totalorder %s51_s25, %s66_s1  ;;  %p72_p2 = scmp.lt.s32.totalorder %s66_s1, %s66_s1 }
   0x7   :  { %41 = vst [vmem:[#allocation2] sm:$0xff] %v37_v10  ;;  %42 = vst [vmem:[#allocation2 + $0x8] sm:$0xff] %v38_v11  ;;  %p73_p3 = por %p72_p2, %p71_p1 }
   0x8   :  { %43 = vst [vmem:[#allocation2 + $0x10] sm:$0xff] %v39_v12  ;;  %44 = vst [vmem:[#allocation2 + $0x18] sm:$0xff] %v40_v13 }
   0x9   :  { %p74_p4 = pnand %p73_p3, %p67_p0 }
   0xb   :  { %77 = shalt.err (!%p74_p4)
}
   0xc   :  { %s89_s0 = smov 128   ;;  %s90_s2 = smov 8  }
   0xd   :  { %56 = dma.vmem_to_hbm [thread:$0]  %s51_s25, 512, %s135_s3, [#allocation3], %s89_s0, %s89_s0, %s90_s2  }
   0xe   :  { %86 = dma.done.wait [#allocation3], 512  }
   0xf   :  { %87 = vsyncadd [#allocation3], 4294966784 }
  0x10   :  { %60 = vsyncpa [#allocation3], 1 }

// kernel: transformer_decoder_stage.6
= control target key start
LH: loop header
LB: loop body
LE: loop exit
PB: predicated region body
PF: predicated region fallthrough
CT: control target
= control target key end

     0   :  { %v1007_v1 = vmov 0   ;;  %vm792_vm0 = vcmask 1040384   ;;  %s1304_s3 = inlined_call_operand.vmem [shape: bf16[128,512], index: 3, kind: input, shape index: {}]   ;;  %s1305_s0 = inlined_call_operand.vmem [shape: f32[32,128], index: 0, kind: input, shape index: {}]   ;;  %s1306_s1 = inlined_call_operand.vmem [shape: f32[1,128], index: 1, kind: input, shape index: {}]   ;;  %s1307_s2 = inlined_call_operand.vmem [shape: f32[1,128], index: 2, kind: input, shape index: {}]   ;;  %s1308_s5 = inlined_call_operand.vmem [shape: bf16[512,128], index: 5, kind: input, shape index: {}]   ;;  %s1309_s4 = inlined_call_operand.vmem [shape: f32[1,512], index: 4, kind: input, shape index: {}]   ;;  %s1310_s6 = inlined_call_operand.vmem [shape: f32[1,128], index: 6, kind: input, shape index: {}]   ;;  %s1311_s7 = inlined_call_operand.vmem [shape: f32[32,128], index: 7, kind: output, shape index: {0}]   ;;  %s1312_s8 = inlined_call_operand.vmem [shape: f32[1,2,128], index: 8, kind: output, shape index: {1}]  }
   0x1   :  { %v927_v0 = vld [vmem:[%s1304_s3 + $0xe4] ss:$16 sps:$4 sm:$0xff]   ;;  %303 = vmatprep.mubr.bf16.mxu0 %v1007_v1  ;;  %356 = vmatprep.mubr.bf16.mxu1 %v1007_v1  ;;  %v929_v2 = vld [vmem:[%s1304_s3 + $0xec] ss:$16 sps:$4 sm:$0xff]   ;;  %v931_v3 = vld [vmem:[%s1304_s3 + $0xe0] ss:$16 sps:$4 sm:$0xff]  }
   0x2   :  { %271 = vmatprep.subr.bf16.mxu0 %v927_v0  ;;  %v932_v4 = vld [vmem:[%s1304_s3 + $0xe8] ss:$16 sps:$4 sm:$0xff]   ;;  %324 = vmatprep.subr.bf16.mxu1 %v929_v2  ;;  %v933_v5 = vld [vmem:[%s1304_s3 + $0xc4] ss:$16 sps:$4 sm:$0xff]   ;;  %v935_v6 = vld [vmem:[%s1304_s3 + $0xcc] ss:$16 sps:$4 sm:$0xff]  }
   0x3   :  { %272 = vmatpush1.bf16.msra.mxu0 %v931_v3  ;;  %325 = vmatpush1.bf16.msra.mxu1 %v932_v4  ;;  %v937_v7 = vld [vmem:[%s1304_s3 + $0xc0] ss:$16 sps:$4 sm:$0xff]   ;;  %v938_v8 = vld [vmem:[%s1304_s3 + $0xc8] ss:$16 sps:$4 sm:$0xff]   ;;  %v939_v9 = vld [vmem:[%s1304_s3 + $0xa4] ss:$16 sps:$4 sm:$0xff]  }
   0x4   :  { %273 = vmatprep.subr.bf16.mxu0 %v933_v5  ;;  %326 = vmatprep.subr.bf16.mxu1 %v935_v6  ;;  %v941_v10 = vld [vmem:[%s1304_s3 + $0xac] ss:$16 sps:$4 sm:$0xff]   ;;  %v943_v11 = vld [vmem:[%s1304_s3 + $0xa0] ss:$16 sps:$4 sm:$0xff]   ;;  %v944_v12 = vld [vmem:[%s1304_s3 + $0xa8] ss:$16 sps:$4 sm:$0xff]  }
   0x5   :  { %v945_v13 = vld [vmem:[%s1304_s3 + $0x84] ss:$16 sps:$4 sm:$0xff]   ;;  %v947_v14 = vld [vmem:[%s1304_s3 + $0x8c] ss:$16 sps:$4 sm:$0xff]   ;;  %v949_v15 = vld [vmem:[%s1304_s3 + $0x80] ss:$16 sps:$4 sm:$0xff]  }
   0x6   :  { %v950_v16 = vld [vmem:[%s1304_s3 + $0x88] ss:$16 sps:$4 sm:$0xff]   ;;  %v951_v17 = vld [vmem:[%s1304_s3 + $0x64] ss:$16 sps:$4 sm:$0xff]   ;;  %v953_v18 = vld [vmem:[%s1304_s3 + $0x6c] ss:$16 sps:$4 sm:$0xff]  }
   0x7   :  { %274 = vmatpush1.bf16.msra.mxu0 %v937_v7  ;;  %327 = vmatpush1.bf16.msra.mxu1 %v938_v8  ;;  %v955_v19 = vld [vmem:[%s1304_s3 + $0x60] ss:$16 sps:$4 sm:$0xff]   ;;  %v956_v20 = vld [vmem:[%s1304_s3 + $0x68] ss:$16 sps:$4 sm:$0xff]   ;;  %v957_v21 = vld [vmem:[%s1304_s3 + $0x44] ss:$16 sps:$4 sm:$0xff]  }
   0x8   :  { %275 = vmatprep.subr.bf16.mxu0 %v939_v9  ;;  %328 = vmatprep.subr.bf16.mxu1 %v941_v10  ;;  %v959_v22 = vld [vmem:[%s1304_s3 + $0x4c] ss:$16 sps:$4 sm:$0xff]   ;;  %v961_v23 = vld [vmem:[%s1304_s3 + $0x40] ss:$16 sps:$4 sm:$0xff]   ;;  %v962_v24 = vld [vmem:[%s1304_s3 + $0x48] ss:$16 sps:$4 sm:$0xff]  }
   0x9   :  { %v963_v25 = vld [vmem:[%s1304_s3 + $0x24] ss:$16 sps:$4 sm:$0xff]   ;;  %v965_v26 = vld [vmem:[%s1304_s3 + $0x2c] ss:$16 sps:$4 sm:$0xff]   ;;  %v967_v29 = vld [vmem:[%s1304_s3 + $0x20] ss:$16 sps:$4 sm:$0xff]  }
   0xa   :  { %v29_v27 = vld [vmem:[%s1305_s0] sm:$0xff]  ;;  %v30_v28 = vld [vmem:[%s1305_s0 + $0x8] sm:$0xff]  ;;  %v31_v39 = vld [vmem:[%s1305_s0 + $0x10] sm:$0xff] }
   0xb   :  { %276 = vmatpush1.bf16.msra.mxu0 %v943_v11  ;;  %329 = vmatpush1.bf16.msra.mxu1 %v944_v12  ;;  %v968_v30 = vld [vmem:[%s1304_s3 + $0x28] ss:$16 sps:$4 sm:$0xff]   ;;  %v803_v31 = vld [vmem:[%s1306_s1] ss:$0 sm:$0xff]  ;;  %v969_v32 = vld [vmem:[%s1304_s3 + $0x4] ss:$16 sps:$4 sm:$0xff]  }
   0xc   :  { %277 = vmatprep.subr.bf16.mxu0 %v945_v13  ;;  %330 = vmatprep.subr.bf16.mxu1 %v947_v14  ;;  %v40_v33 = vmul.f32 %v803_v31, %v29_v27  ;;  %v41_v34 = vmul.f32 %v803_v31, %v30_v28  ;;  %v804_v35 = vld [vmem:[%s1307_s2] ss:$0 sm:$0xff]  ;;  %v971_v36 = vld [vmem:[%s1304_s3 + $0xc] ss:$16 sps:$4 sm:$0xff]   ;;  %v974_v38 = vld [vmem:[%s1304_s3 + $0x8] ss:$16 sps:$4 sm:$0xff]   ;;  %v42_v46 = vmul.f32 %v803_v31, %v31_v39 }
   0xd   :  { %v973_v37 = vld [vmem:[%s1304_s3] ss:$16 sps:$4 sm:$0xff]   ;;  %v32_v42 = vld [vmem:[%s1305_s0 + $0x18] sm:$0xff]  ;;  %v983_v56 = vld [vmem:[%s1308_s5 + $0x68] sm:$0xff]  }
   0xe   :  { %v1166_v40 = vadd.f32 %v804_v35, %v40_v33  ;;  %v1168_v41 = vadd.f32 %v804_v35, %v41_v34  ;;  %v975_v43 = vld [vmem:[%s1308_s5 + $0x78] sm:$0xff]   ;;  %v43_v47 = vmul.f32 %v803_v31, %v32_v42  ;;  %v979_v50 = vld [vmem:[%s1308_s5 + $0x70] sm:$0xff]   ;;  %v1193_v52 = vadd.f32 %v804_v35, %v42_v46  ;;  %v984_v57 = vld [vmem:[%s1308_s5 + $0xe8] sm:$0xff]  }
   0xf   :  { %278 = vmatpush1.bf16.msra.mxu0 %v949_v15  ;;  %331 = vmatpush1.bf16.msra.mxu1 %v950_v16  ;;  %v976_v44 = vld [vmem:[%s1308_s5 + $0xf8] sm:$0xff]   ;;  %v980_v51 = vld [vmem:[%s1308_s5 + $0xf0] sm:$0xff]   ;;  %v985_v59 = vld [vmem:[%s1308_s5 + $0x28] sm:$0xff]  }
  0x10   :  { %279 = vmatprep.subr.bf16.mxu0 %v951_v17  ;;  %332 = vmatprep.subr.bf16.mxu1 %v953_v18  ;;  %v55_v45 = vpack.c.bf16 %v1168_v41, %v1166_v40  ;;  %v977_v48 = vld [vmem:[%s1308_s5 + $0x38] sm:$0xff]   ;;  %v1195_v53 = vadd.f32 %v804_v35, %v43_v47  ;;  %v981_v54 = vld [vmem:[%s1308_s5 + $0x30] sm:$0xff]   ;;  %v986_v60 = vld [vmem:[%s1308_s5 + $0xa8] sm:$0xff]   ;;  %v91_v17 = vlaneseq }
  0x11   :  { %v978_v49 = vld [vmem:[%s1308_s5 + $0xb8] sm:$0xff]   ;;  %v982_v55 = vld [vmem:[%s1308_s5 + $0xb0] sm:$0xff]   ;;  %v987_v61 = vld [vmem:[%s1308_s5 + $0x60] sm:$0xff]  }
  0x12   :  { %v56_v58 = vpack.c.bf16 %v1195_v53, %v1193_v52  ;;  %v988_v62 = vld [vmem:[%s1308_s5 + $0xe0] sm:$0xff]   ;;  %v992_v2 = vld [vmem:[%s1308_s5 + $0xd8] sm:$0xff]   ;;  %v995_v5 = vld [vmem:[%s1308_s5 + $0x50] sm:$0xff]   ;;  %v92_v18 = vshrl.u32 %v91_v17, 7 }
  0x13   :  { %280 = vmatpush1.bf16.msra.mxu0 %v955_v19  ;;  %333 = vmatpush1.bf16.msra.mxu1 %v956_v20  ;;  %v989_v63 = vld [vmem:[%s1308_s5 + $0x20] sm:$0xff]   ;;  %v993_v3 = vld [vmem:[%s1308_s5 + $0x18] sm:$0xff]   ;;  %v996_v6 = vld [vmem:[%s1308_s5 + $0xd0] sm:$0xff]  }
  0x14   :  { %281 = vmatprep.subr.bf16.mxu0 %v957_v21  ;;  %334 = vmatprep.subr.bf16.mxu1 %v959_v22  ;;  %v990_v0 = vld [vmem:[%s1308_s5 + $0xa0] sm:$0xff]   ;;  %v994_v4 = vld [vmem:[%s1308_s5 + $0x98] sm:$0xff]   ;;  %v997_v7 = vld [vmem:[%s1308_s5 + $0x10] sm:$0xff]   ;;  %v97_v19 = vsub.s32 1, %v92_v18  ;;  %v105_v20 = vsub.s32 3, %v92_v18  ;;  %v93_v21 = vsub.s32 0, %v92_v18 }
  0x15   :  { %v998_v8 = vld [vmem:[%s1308_s5 + $0x90] sm:$0xff]   ;;  %v999_v9 = vld [vmem:[%s1308_s5 + $0x48] sm:$0xff]   ;;  %v1003_v13 = vld [vmem:[%s1308_s5 + $0x40] sm:$0xff]   ;;  %v101_v22 = vsub.s32 2, %v92_v18 }
  0x16   :  { %v1000_v10 = vld [vmem:[%s1308_s5 + $0xc8] sm:$0xff]   ;;  %v1004_v14 = vld [vmem:[%s1308_s5 + $0xc0] sm:$0xff]  }
  0x17   :  { %282 = vmatpush1.bf16.msra.mxu0 %v961_v23  ;;  %335 = vmatpush1.bf16.msra.mxu1 %v962_v24  ;;  %v1001_v11 = vld [vmem:[%s1308_s5 + $0x8] sm:$0xff]   ;;  %v1005_v15 = vld [vmem:[%s1308_s5] sm:$0xff]  }
  0x18   :  { %283 = vmatprep.subr.bf16.mxu0 %v963_v25  ;;  %336 = vmatprep.subr.bf16.mxu1 %v965_v26  ;;  %v1002_v12 = vld [vmem:[%s1308_s5 + $0x88] sm:$0xff]   ;;  %v1006_v16 = vld [vmem:[%s1308_s5 + $0x80] sm:$0xff]  }
  0x19   :  { %v89_v23 = vld [vmem:[%s1309_s4] sm:$0xf] }
  0x1a   :  { %v98_v26 = vrot.slane %v89_v23, %v97_v19  ;;  %v106_v27 = vrot.slane %v89_v23, %v105_v20  ;;  %v94_v28 = vrot.slane %v89_v23, %v93_v21 }
  0x1b   :  { %284 = vmatpush1.bf16.msra.mxu0 %v967_v29  ;;  %337 = vmatpush1.bf16.msra.mxu1 %v968_v30  ;;  %v102_v29 = vrot.slane %v89_v23, %v101_v22 }
  0x1c   :  { %285 = vmatprep.subr.bf16.mxu0 %v969_v32  ;;  %338 = vmatprep.subr.bf16.mxu1 %v971_v36 }
  0x1f   :  { %286 = vmatpush1.bf16.msra.mxu0 %v973_v37  ;;  %339 = vmatpush1.bf16.msra.mxu1 %v974_v38 }
  0x20   :  { %870 = vmatprep.subr.bf16.mxu0 %v975_v43  ;;  %898 = vmatprep.subr.bf16.mxu1 %v976_v44 }
  0x22   :  { %304 = vmatmul.mubr.bf16.vlgmr.msra.gmra.mxu0 %v55_v45  ;;  %357 = vmatmul.mubr.bf16.vlgmr.msra.gmra.mxu1 %v55_v45 }
  0x23   :  { %313 = vmatprep.mubr.bf16.mxu0 %v1007_v1  ;;  %366 = vmatprep.mubr.bf16.mxu1 %v1007_v1  ;;  %v991_v1 = vld [vmem:[%s1308_s5 + $0x58] sm:$0xff]  }
  0x24   :  { %871 = vmatpush3.bf16.msra.mxu0 %v977_v48  ;;  %899 = vmatpush3.bf16.msra.mxu1 %v978_v49 }
  0x25   :  { %872 = vmatprep.subr.bf16.mxu0 %v979_v50  ;;  %900 = vmatprep.subr.bf16.mxu1 %v980_v51 }
  0x28   :  { %873 = vmatpush3.bf16.msra.mxu0 %v981_v54  ;;  %901 = vmatpush3.bf16.msra.mxu1 %v982_v55 }
  0x29   :  { %874 = vmatprep.subr.bf16.mxu0 %v983_v56  ;;  %902 = vmatprep.subr.bf16.mxu1 %v984_v57 }
  0x2a   :  { %314 = vmatmul.mubr.bf16.gmra.mxu0 %v56_v58  ;;  %367 = vmatmul.mubr.bf16.gmra.mxu1 %v56_v58 }
  0x2c   :  { %875 = vmatpush3.bf16.msra.mxu0 %v985_v59  ;;  %903 = vmatpush3.bf16.msra.mxu1 %v986_v60 }
  0x2d   :  { %876 = vmatprep.subr.bf16.mxu0 %v987_v61  ;;  %904 = vmatprep.subr.bf16.mxu1 %v988_v62 }
  0x30   :  { %877 = vmatpush3.bf16.msra.mxu0 %v989_v63  ;;  %905 = vmatpush3.bf16.msra.mxu1 %v990_v0 }
  0x31   :  { %878 = vmatprep.subr.bf16.mxu0 %v991_v1  ;;  %906 = vmatprep.subr.bf16.mxu1 %v992_v2 }
  0x34   :  { %879 = vmatpush3.bf16.msra.mxu0 %v993_v3  ;;  %907 = vmatpush3.bf16.msra.mxu1 %v994_v4 }
  0x35   :  { %880 = vmatprep.subr.bf16.mxu0 %v995_v5  ;;  %908 = vmatprep.subr.bf16.mxu1 %v996_v6 }
  0x38   :  { %881 = vmatpush3.bf16.msra.mxu0 %v997_v7  ;;  %909 = vmatpush3.bf16.msra.mxu1 %v998_v8 }
  0x39   :  { %882 = vmatprep.subr.bf16.mxu0 %v999_v9  ;;  %910 = vmatprep.subr.bf16.mxu1 %v1000_v10 }
  0x3c   :  { %883 = vmatpush3.bf16.msra.mxu0 %v1001_v11  ;;  %911 = vmatpush3.bf16.msra.mxu1 %v1002_v12 }
  0x3d   :  { %884 = vmatprep.subr.bf16.mxu0 %v1003_v13  ;;  %912 = vmatprep.subr.bf16.mxu1 %v1004_v14 }
  0x40   :  { %885 = vmatpush3.bf16.msra.mxu0 %v1005_v15  ;;  %913 = vmatpush3.bf16.msra.mxu1 %v1006_v16 }
  0xe2   :  { %v305_v24 = vpop.f32.mrf.mxu0  ;;  %v358_v25 = vpop.f32.mrf.mxu1 }
  0xe3   :  { %v306_v38 = vadd.f32 %v305_v24, %v94_v28  ;;  %v359_v39 = vadd.f32 %v358_v25, %v102_v29 }
  0xe4   :  { %v307_v30 = vpop.f32.mrf.mxu0  ;;  %v360_v31 = vpop.f32.mrf.mxu1 }
  0xe5   :  { %v308_v34 = vadd.f32 %v307_v30, %v98_v26  ;;  %v361_v35 = vadd.f32 %v360_v31, %v106_v27  ;;  %v377_v56 = vmax.f32 %v306_v38, 0.0  ;;  %v379_v57 = vmax.f32 %v359_v39, 0.0 }
  0xe6   :  { %v309_v32 = vpop.f32.mrf.mxu0  ;;  %v362_v33 = vpop.f32.mrf.mxu1 }
  0xe7   :  { %v310_v36 = vadd.f32 %v309_v32, %v94_v28  ;;  %v363_v37 = vadd.f32 %v362_v33, %v102_v29  ;;  %v378_v50 = vmax.f32 %v308_v34, 0.0  ;;  %v380_v51 = vmax.f32 %v361_v35, 0.0 }
  0xe8   :  { %v311_v42 = vpop.f32.mrf.mxu0  ;;  %v364_v43 = vpop.f32.mrf.mxu1 }
  0xe9   :  { %v312_v44 = vadd.f32 %v311_v42, %v98_v26  ;;  %v365_v45 = vadd.f32 %v364_v43, %v106_v27  ;;  %v381_v46 = vmax.f32 %v310_v36, 0.0  ;;  %v383_v47 = vmax.f32 %v363_v37, 0.0 }
  0xea   :  { %v315_v48 = vpop.f32.mrf.mxu0  ;;  %v368_v49 = vpop.f32.mrf.mxu1 }
  0xeb   :  { %v382_v54 = vmax.f32 %v312_v44, 0.0  ;;  %v384_v55 = vmax.f32 %v365_v45, 0.0  ;;  %v393_v62 = vpack.c.bf16 %v381_v46, %v377_v56  ;;  %v395_v63 = vpack.c.bf16 %v383_v47, %v379_v57 }
  0xec   :  { %v317_v58 = vpop.f32.mrf.mxu0  ;;  %v370_v59 = vpop.f32.mrf.mxu1  ;;  %v316_v6 = vadd.f32 %v315_v48, %v94_v28  ;;  %v369_v7 = vadd.f32 %v368_v49, %v102_v29 }
  0xed   :  { %v394_v60 = vpack.c.bf16 %v382_v54, %v378_v50  ;;  %v396_v61 = vpack.c.bf16 %v384_v55, %v380_v51  ;;  %v318_v0 = vadd.f32 %v317_v58, %v98_v26  ;;  %v371_v3 = vadd.f32 %v370_v59, %v106_v27 }
  0xee   :  { %v319_v1 = vpop.f32.mrf.mxu0  ;;  %v372_v2 = vpop.f32.mrf.mxu1  ;;  %v385_v18 = vmax.f32 %v316_v6, 0.0  ;;  %v387_v19 = vmax.f32 %v369_v7, 0.0 }
  0xef   :  { %v320_v4 = vadd.f32 %v319_v1, %v94_v28  ;;  %v373_v5 = vadd.f32 %v372_v2, %v102_v29  ;;  %696 = vmatprep.mubr.bf16.mxu0 %v394_v60  ;;  %745 = vmatprep.mubr.bf16.mxu1 %v396_v61  ;;  %v386_v14 = vmax.f32 %v318_v0, 0.0  ;;  %v388_v15 = vmax.f32 %v371_v3, 0.0 }
  0xf0   :  { %v321_v8 = vpop.f32.mrf.mxu0  ;;  %v374_v9 = vpop.f32.mrf.mxu1  ;;  %697 = vmatmul.mubr.bf16.vlgmr.msra.gmra.mxu0 %v393_v62  ;;  %746 = vmatmul.mubr.bf16.vlgmr.msra.gmra.mxu1 %v395_v63 }
  0xf1   :  { %v322_v10 = vadd.f32 %v321_v8, %v98_v26  ;;  %v375_v11 = vadd.f32 %v374_v9, %v106_v27  ;;  %v389_v12 = vmax.f32 %v320_v4, 0.0  ;;  %v391_v13 = vmax.f32 %v373_v5, 0.0  ;;  %v837_v26 = vld [vmem:[%s1310_s6] ss:$0 sm:$0xff] }
  0xf3   :  { %v390_v16 = vmax.f32 %v322_v10, 0.0  ;;  %v392_v17 = vmax.f32 %v375_v11, 0.0  ;;  %v397_v22 = vpack.c.bf16 %v389_v12, %v385_v18  ;;  %v399_v23 = vpack.c.bf16 %v391_v13, %v387_v19 }
  0xf5   :  { %v398_v20 = vpack.c.bf16 %v390_v16, %v386_v14  ;;  %v400_v21 = vpack.c.bf16 %v392_v17, %v388_v15 }
  0xf7   :  { %704 = vmatprep.mubr.bf16.mxu0 %v398_v20  ;;  %753 = vmatprep.mubr.bf16.mxu1 %v400_v21 }
  0xf8   :  { %705 = vmatmul.mubr.bf16.gmra.mxu0 %v397_v22  ;;  %754 = vmatmul.mubr.bf16.gmra.mxu1 %v399_v23 }
 0x1b0   :  { %v886_v24 = vpop.f32.mrf.mxu0  ;;  %v914_v25 = vpop.f32.mrf.mxu1 }
 0x1b2   :  { %v887_v27 = vpop.f32.mrf.mxu0  ;;  %v915_v28 = vpop.f32.mrf.mxu1 }
 0x1b3   :  { %v888_v29 = vadd.f32 %v887_v27, %v886_v24  ;;  %v916_v33 = vadd.f32 %v915_v28, %v914_v25 }
 0x1b4   :  { %v889_v30 = vpop.f32.mrf.mxu0  ;;  %v917_v31 = vpop.f32.mrf.mxu1 }
 0x1b5   :  { %v699_v32 = vadd.f32 %v888_v29, %v837_v26 }
 0x1b6   :  { %v890_v34 = vpop.f32.mrf.mxu0  ;;  %v918_v35 = vpop.f32.mrf.mxu1 }
 0x1b7   :  { %v748_v36 = vadd.f32 %v916_v33, %v699_v32  ;;  %v891_v37 = vadd.f32 %v890_v34, %v889_v30  ;;  %v919_v44 = vadd.f32 %v918_v35, %v917_v31 }
 0x1b8   :  { %v892_v38 = vpop.f32.mrf.mxu0  ;;  %v920_v39 = vpop.f32.mrf.mxu1 }
 0x1b9   :  { %v762_v42 = vadd.f32 %v748_v36, %v1166_v40  ;;  %v702_v43 = vadd.f32 %v891_v37, %v837_v26 }
 0x1ba   :  { %v893_v45 = vpop.f32.mrf.mxu0  ;;  %v921_v46 = vpop.f32.mrf.mxu1 }
 0x1bb   :  { %766 = vst [vmem:[%s1311_s7] sm:$0xff] %v762_v42  ;;  %v751_v47 = vadd.f32 %v919_v44, %v702_v43  ;;  %v894_v48 = vadd.f32 %v893_v45, %v892_v38  ;;  %v922_v55 = vadd.f32 %v921_v46, %v920_v39  ;;  %v779_v63 = vmul.f32 %v762_v42, %v762_v42 }
 0x1bc   :  { %v895_v49 = vpop.f32.mrf.mxu0  ;;  %v923_v50 = vpop.f32.mrf.mxu1 }
 0x1bd   :  { %v763_v51 = vadd.f32 %v751_v47, %v1168_v41  ;;  %v707_v54 = vadd.f32 %v894_v48, %v837_v26 }
 0x1be   :  { %v896_v56 = vpop.f32.mrf.mxu0  ;;  %v924_v57 = vpop.f32.mrf.mxu1 }
 0x1bf   :  { %767 = vst [vmem:[%s1311_s7 + $0x8] sm:$0xff] %v763_v51  ;;  %v756_v40 = vadd.f32 %v922_v55, %v707_v54  ;;  %v897_v58 = vadd.f32 %v896_v56, %v895_v49  ;;  %v780_v59 = vmul.f32 %v763_v51, %v763_v51  ;;  %v925_v62 = vadd.f32 %v924_v57, %v923_v50 }
 0x1c0   :  { %v770_v0 = vadd.f32 %v763_v51, %v762_v42 }
 0x1c1   :  { %v764_v60 = vadd.f32 %v756_v40, %v1193_v52  ;;  %v710_v61 = vadd.f32 %v897_v58, %v837_v26  ;;  %v783_v2 = vadd.f32 %v780_v59, %v779_v63 }
 0x1c3   :  { %768 = vst [vmem:[%s1311_s7 + $0x10] sm:$0xff] %v764_v60  ;;  %v781_v41 = vmul.f32 %v764_v60, %v764_v60  ;;  %v759_v1 = vadd.f32 %v925_v62, %v710_v61  ;;  %v771_v3 = vadd.f32 %v770_v0, %v764_v60 }
 0x1c5   :  { %v765_v4 = vadd.f32 %v759_v1, %v1195_v53  ;;  %v784_v5 = vadd.f32 %v783_v2, %v781_v41 }
 0x1c7   :  { %769 = vst [vmem:[%s1311_s7 + $0x18] sm:$0xff] %v765_v4  ;;  %v772_v52 = vadd.f32 %v771_v3, %v765_v4  ;;  %v782_v6 = vmul.f32 %v765_v4, %v765_v4 }
 0x1c9   :  { %v773_v7 = vrot.slane %v772_v52, 4  ;;  %v785_v8 = vadd.f32 %v784_v5, %v782_v6 }
 0x1cb   :  { %v774_v9 = vadd.f32 %v773_v7, %v772_v52  ;;  %v786_v10 = vrot.slane %v785_v8, 4 }
 0x1cd   :  { %v775_v11 = vrot.slane %v774_v9, 2  ;;  %v787_v12 = vadd.f32 %v786_v10, %v785_v8 }
 0x1cf   :  { %v776_v13 = vadd.f32 %v775_v11, %v774_v9  ;;  %v788_v14 = vrot.slane %v787_v12, 2 }
 0x1d1   :  { %v777_v15 = vrot.slane %v776_v13, 1  ;;  %v789_v16 = vadd.f32 %v788_v14, %v787_v12 }
 0x1d3   :  { %v790_v17 = vrot.slane %v789_v16, 1  ;;  %v778_v53 = vadd.f32 %v777_v15, %v776_v13 }
 0x1d5   :  { %v791_v18 = vadd.f32 %v790_v17, %v789_v16 }
 0x1d7   :  { %v793_v19 = vsel %vm792_vm0, %v778_v53, %v791_v18 }
 0x1d8   :  { %794 = vst [vmem:[%s1312_s8] sm:$0x3] %v793_v19 }

// kernel: transformer_decoder_stage.4
= control target key start
LH: loop header
LB: loop body
LE: loop exit
PB: predicated region body
PF: predicated region fallthrough
CT: control target
= control target key end

     0   :  { %s2987_s27 = smov 0   ;;  %s3523_s0 = inlined_call_operand.vmem [shape: f32[2,16,128], index: 0, kind: input, shape index: {}, may-alias: {0,1}]   ;;  %s3524_s1 = inlined_call_operand.vmem [shape: f32[2,16,128], index: 1, kind: input, shape index: {}, may-alias: {0,1}]   ;;  %s3525_s2 = inlined_call_operand.vmem [shape: f32[1,128], index: 2, kind: input, shape index: {}]   ;;  %s3526_s3 = inlined_call_operand.vmem [shape: f32[1,128], index: 3, kind: input, shape index: {}]   ;;  %s3527_s4 = inlined_call_operand.vmem [shape: bf16[4,128,32], index: 4, kind: input, shape index: {}]   ;;  %s3528_s5 = inlined_call_operand.vmem [shape: bf16[4,128,32], index: 5, kind: input, shape index: {}]   ;;  %s3529_s6 = inlined_call_operand.vmem [shape: bf16[4,128,32], index: 6, kind: input, shape index: {}]   ;;  %s3530_s7 = inlined_call_operand.vmem [shape: f32[2,16,128], index: 7, kind: output, shape index: {0}]   ;;  %s3531_s8 = inlined_call_operand.vmem [shape: f32[2,2,128], index: 8, kind: output, shape index: {1}]  }
   0x1 LB: > { %s2253_s28 = sadd.s32 4294967295, %s2935_s27   ;;  %p2257_p0 = scmp.ge.s32.totalorder %s2935_s27, 1  ;;  %s2935_s27 = sphi %s2987_s27, %s19_s27  }
   0x2   : > { %p275_p1 = scmp.lt.s32.totalorder %s2935_s27, 3 }
   0x4   : > { %p276_p2 = pnand %p2257_p0, %p275_p1 }
   0x5   : > { %p318_p3 = scmp.lt.s32.totalorder (!%p276_p2), %s2253_s28, 1  ;;  %s2939_s19 = smov (!%p276_p2), 32  }
   0x6   : > { %279 = sbr.rel (%p276_p2) target bundleno = 1198 (0x4ae), region = 48  ;;  %s2940_s20 = smov (!%p276_p2), 64  }
   0x7   : > { %s2941_s21 = smov (!%p276_p2), 96  }
   0xb   : > { %v2801_v0 = vld [vmem:[%s3527_s4 + $0x38] sm:$0xff]   ;;  %v2937_v1 = vmov 0.0   ;;  %v2803_v3 = vld [vmem:[%s3527_s4 + $0x30] sm:$0xff]   ;;  %vm2938_vm0 = vmmov 0   ;;  %v2805_v5 = vld [vmem:[%s3527_s4 + $0x28] sm:$0xff]   ;;  %s3533_s28 = smov (!%p318_p3, %s2253_s28), 1 }
   0xc   : > { %2500 = vmatprep.subr.bf16.mxu0 %v2937_v1  ;;  %2520 = vmatprep.subr.bf16.mxu1 %v2937_v1  ;;  %v2802_v2 = vld [vmem:[%s3527_s4 + $0x78] sm:$0xff]   ;;  %v2804_v4 = vld [vmem:[%s3527_s4 + $0x70] sm:$0xff]   ;;  %v2806_v6 = vld [vmem:[%s3527_s4 + $0x68] sm:$0xff]   ;;  %s3033_s23 = sshll.u32 %s3533_s28, 4  ;;  %vm1630_vm1 = vcmask 261120   ;;  %vm1827_vm2 = vcmask 130048  }
   0xd   : > { %2501 = vmatpush3.bf16.msra.mxu0 %v2801_v0  ;;  %2516 = vmatprep.mubr.msk.bf16.mxu0 %vm2938_vm0, %v2937_v1  ;;  %v2807_v7 = vld [vmem:[%s3527_s4 + $0x20] sm:$0xff]   ;;  %v2809_v9 = vld [vmem:[%s3527_s4 + $0x18] sm:$0xff]   ;;  %s322_s30 = scalar_lea.vmem %s3523_s0, %s3033_s23  ;;  %v2811_v11 = vld [vmem:[%s3527_s4 + $0x10] sm:$0xff]   ;;  %s327_s11 = scalar_lea.vmem %s3524_s1, %s3033_s23  ;;  %vm2126_vm3 = vcmask 523264   ;;  %vm2129_vm4 = vcmask 785408   ;;  %vm2152_vm5 = vcmask 1040384  }
   0xe   : > { %2521 = vmatpush3.bf16.msra.mxu1 %v2802_v2  ;;  %2502 = vmatprep.subr.bf16.mxu0 %v2937_v1  ;;  %v2808_v8 = vld [vmem:[%s3527_s4 + $0x60] sm:$0xff]   ;;  %v2810_v10 = vld [vmem:[%s3527_s4 + $0x58] sm:$0xff]   ;;  %v339_v13 = vld [vmem:[%s322_s30 + $0x8] sm:$0xff]  ;;  %s332_s25 = scalar_lea.vmem %s3530_s7, %s3033_s23  ;;  %s2264_s23 = sshll.u32 %s3533_s28, 1 }
   0xf   : > { %2522 = vmatprep.subr.bf16.mxu1 %v2937_v1  ;;  %2536 = vmatprep.mubr.msk.bf16.mxu1 %vm2938_vm0, %v2937_v1  ;;  %v338_v12 = vld [vmem:[%s322_s30] sm:$0xff]  ;;  %v2812_v15 = vld [vmem:[%s3527_s4 + $0x50] sm:$0xff]   ;;  %v2813_v16 = vld [vmem:[%s3527_s4 + $0x8] sm:$0xff]   ;;  %s336_s30 = scalar_lea.vmem %s3531_s8, %s2264_s23 }
  0x10   : > { %v2265_v14 = vld [vmem:[%s3525_s2] ss:$0 sm:$0xff]  ;;  %v2814_v20 = vld [vmem:[%s3527_s4 + $0x48] sm:$0xff]   ;;  %v2817_v26 = vld [vmem:[%s3527_s4 + $0xb8] sm:$0xff]  }
  0x11   : > { %2503 = vmatpush3.bf16.msra.mxu0 %v2803_v3  ;;  %v347_v17 = vmul.f32 %v2265_v14, %v338_v12  ;;  %v348_v18 = vmul.f32 %v2265_v14, %v339_v13  ;;  %v2266_v19 = vld [vmem:[%s3526_s3] ss:$0 sm:$0xff]  ;;  %v2818_v27 = vld [vmem:[%s3527_s4 + $0xf8] sm:$0xff]   ;;  %v2819_v28 = vld [vmem:[%s3527_s4 + $0xb0] sm:$0xff]  }
  0x12   : > { %2523 = vmatpush3.bf16.msra.mxu1 %v2804_v4  ;;  %2504 = vmatprep.subr.bf16.mxu0 %v2937_v1  ;;  %v2815_v23 = vld [vmem:[%s3527_s4] sm:$0xff]   ;;  %v2820_v29 = vld [vmem:[%s3527_s4 + $0xf0] sm:$0xff]   ;;  %v2821_v30 = vld [vmem:[%s3527_s4 + $0xa8] sm:$0xff]  }
  0x13   : > { %2524 = vmatprep.subr.bf16.mxu1 %v2937_v1  ;;  %v3070_v21 = vadd.f32 %v2266_v19, %v347_v17  ;;  %v3072_v22 = vadd.f32 %v2266_v19, %v348_v18  ;;  %v2816_v24 = vld [vmem:[%s3527_s4 + $0x40] sm:$0xff]   ;;  %v2822_v31 = vld [vmem:[%s3527_s4 + $0xe8] sm:$0xff]   ;;  %v2825_v34 = vld [vmem:[%s3527_s4 + $0x98] sm:$0xff]  }
  0x14   : > { %v2823_v32 = vld [vmem:[%s3527_s4 + $0xa0] sm:$0xff]   ;;  %v2826_v35 = vld [vmem:[%s3527_s4 + $0xd8] sm:$0xff]   ;;  %v2827_v36 = vld [vmem:[%s3527_s4 + $0x90] sm:$0xff]  }
  0x15   : > { %2505 = vmatpush3.bf16.msra.mxu0 %v2805_v5  ;;  %v360_v25 = vpack.c.bf16 %v3072_v22, %v3070_v21  ;;  %v2824_v33 = vld [vmem:[%s3527_s4 + $0xe0] sm:$0xff]   ;;  %v2828_v37 = vld [vmem:[%s3527_s4 + $0xd0] sm:$0xff]   ;;  %v2829_v38 = vld [vmem:[%s3527_s4 + $0x88] sm:$0xff]  }
  0x16   : > { %2525 = vmatpush3.bf16.msra.mxu1 %v2806_v6  ;;  %2506 = vmatprep.subr.bf16.mxu0 %v2937_v1  ;;  %v2830_v39 = vld [vmem:[%s3527_s4 + $0xc8] sm:$0xff]   ;;  %v2831_v40 = vld [vmem:[%s3527_s4 + $0x80] sm:$0xff]   ;;  %v2833_v42 = vld [vmem:[%s3528_s5 + $0x38] sm:$0xff]  }
  0x17   : > { %2526 = vmatprep.subr.bf16.mxu1 %v2937_v1  ;;  %v2832_v41 = vld [vmem:[%s3527_s4 + $0xc0] sm:$0xff]   ;;  %v2834_v43 = vld [vmem:[%s3528_s5 + $0x78] sm:$0xff]   ;;  %v2835_v44 = vld [vmem:[%s3528_s5 + $0x30] sm:$0xff]  }
  0x18   : > { %v2836_v45 = vld [vmem:[%s3528_s5 + $0x70] sm:$0xff]   ;;  %v2837_v46 = vld [vmem:[%s3528_s5 + $0x28] sm:$0xff]   ;;  %v2839_v48 = vld [vmem:[%s3528_s5 + $0x20] sm:$0xff]  }
  0x19   : > { %2507 = vmatpush3.bf16.msra.mxu0 %v2807_v7  ;;  %v2838_v47 = vld [vmem:[%s3528_s5 + $0x68] sm:$0xff]   ;;  %v2840_v49 = vld [vmem:[%s3528_s5 + $0x60] sm:$0xff]   ;;  %v2841_v50 = vld [vmem:[%s3528_s5 + $0x18] sm:$0xff]  }
  0x1a   : > { %2527 = vmatpush3.bf16.msra.mxu1 %v2808_v8  ;;  %2508 = vmatprep.subr.bf16.mxu0 %v2937_v1  ;;  %v2842_v51 = vld [vmem:[%s3528_s5 + $0x58] sm:$0xff]   ;;  %v2843_v52 = vld [vmem:[%s3528_s5 + $0x10] sm:$0xff]   ;;  %v2845_v54 = vld [vmem:[%s3528_s5 + $0x8] sm:$0xff]  }
  0x1b   : > { %2528 = vmatprep.subr.bf16.mxu1 %v2937_v1  ;;  %v2844_v53 = vld [vmem:[%s3528_s5 + $0x50] sm:$0xff]   ;;  %v2846_v55 = vld [vmem:[%s3528_s5 + $0x48] sm:$0xff]   ;;  %v358_v56 = vld [vmem:[%s327_s11] sm:$0xff] }
  0x1c   : > { %v359_v57 = vld [vmem:[%s327_s11 + $0x8] sm:$0xff]  ;;  %v2847_v58 = vld [vmem:[%s3528_s5] sm:$0xff]   ;;  %v2849_v61 = vld [vmem:[%s3528_s5 + $0xb8] sm:$0xff]  }
  0x1d   : > { %2509 = vmatpush3.bf16.msra.mxu0 %v2809_v9  ;;  %v2848_v59 = vld [vmem:[%s3528_s5 + $0x40] sm:$0xff]   ;;  %v3224_v60 = vpack.c.bf16 %v359_v57, %v358_v56  ;;  %v2850_v62 = vld [vmem:[%s3528_s5 + $0xf8] sm:$0xff]   ;;  %v2851_v63 = vld [vmem:[%s3528_s5 + $0xb0] sm:$0xff]  }
  0x1e   : > { %2529 = vmatpush3.bf16.msra.mxu1 %v2810_v10  ;;  %2510 = vmatprep.subr.bf16.mxu0 %v2937_v1  ;;  %v2852_v0 = vld [vmem:[%s3528_s5 + $0xf0] sm:$0xff]   ;;  %v2853_v2 = vld [vmem:[%s3528_s5 + $0xa8] sm:$0xff]   ;;  %v2855_v4 = vld [vmem:[%s3528_s5 + $0xa0] sm:$0xff]  }
  0x1f   : > { %2530 = vmatprep.subr.bf16.mxu1 %v2937_v1  ;;  %v2854_v3 = vld [vmem:[%s3528_s5 + $0xe8] sm:$0xff]   ;;  %v2856_v5 = vld [vmem:[%s3528_s5 + $0xe0] sm:$0xff]   ;;  %v2857_v6 = vld [vmem:[%s3528_s5 + $0x98] sm:$0xff]  }
  0x20   : > { %v2858_v7 = vld [vmem:[%s3528_s5 + $0xd8] sm:$0xff]   ;;  %v2859_v8 = vld [vmem:[%s3528_s5 + $0x90] sm:$0xff]   ;;  %v2861_v10 = vld [vmem:[%s3528_s5 + $0x88] sm:$0xff]  }
  0x21   : > { %2511 = vmatpush3.bf16.msra.mxu0 %v2811_v11  ;;  %v2860_v9 = vld [vmem:[%s3528_s5 + $0xd0] sm:$0xff]   ;;  %v2862_v11 = vld [vmem:[%s3528_s5 + $0xc8] sm:$0xff]   ;;  %v2863_v12 = vld [vmem:[%s3528_s5 + $0x80] sm:$0xff]  }
  0x22   : > { %2531 = vmatpush3.bf16.msra.mxu1 %v2812_v15  ;;  %2512 = vmatprep.subr.bf16.mxu0 %v2937_v1  ;;  %v2864_v13 = vld [vmem:[%s3528_s5 + $0xc0] sm:$0xff]   ;;  %v2865_v14 = vld [vmem:[%s3529_s6 + $0x38] sm:$0xff]   ;;  %v2868_v17 = vld [vmem:[%s3529_s6 + $0x70] sm:$0xff]  }
  0x23   : > { %2532 = vmatprep.subr.bf16.mxu1 %v2937_v1  ;;  %v2866_v15 = vld [vmem:[%s3529_s6 + $0x78] sm:$0xff]   ;;  %v2869_v18 = vld [vmem:[%s3529_s6 + $0x28] sm:$0xff]  }
  0x24   : > { %v2870_v19 = vld [vmem:[%s3529_s6 + $0x68] sm:$0xff]  }
  0x25   : > { %2513 = vmatpush3.bf16.msra.mxu0 %v2813_v16  ;;  %v2867_v16 = vld [vmem:[%s3529_s6 + $0x30] sm:$0xff]  }
  0x26   : > { %2533 = vmatpush3.bf16.msra.mxu1 %v2814_v20  ;;  %2514 = vmatprep.subr.bf16.mxu0 %v2937_v1  ;;  %v2871_v20 = vld [vmem:[%s3529_s6 + $0x20] sm:$0xff]  }
  0x27   : > { %2534 = vmatprep.subr.bf16.mxu1 %v2937_v1 }
  0x29   : > { %2515 = vmatpush3.bf16.msra.mxu0 %v2815_v23  ;;  %v2872_v23 = vld [vmem:[%s3529_s6 + $0x60] sm:$0xff]  }
  0x2a   : > { %2535 = vmatpush3.bf16.msra.mxu1 %v2816_v24  ;;  %2540 = vmatprep.subr.bf16.mxu0 %v2937_v1  ;;  %v2873_v24 = vld [vmem:[%s3529_s6 + $0x18] sm:$0xff]  }
  0x2b   : > { %2560 = vmatprep.subr.bf16.mxu1 %v2937_v1 }
  0x2c   : > { %2517 = vmatmul.mubr.bf16.vlgmr.msra.gmra.mxu0 %v360_v25 }
  0x2d   : > { %2537 = vmatmul.mubr.bf16.vlgmr.msra.gmra.mxu1 %v360_v25  ;;  %2541 = vmatpush3.bf16.msra.mxu0 %v2817_v26  ;;  %v2875_v26 = vld [vmem:[%s3529_s6 + $0x10] sm:$0xff]  }
  0x2e   : > { %2561 = vmatpush3.bf16.msra.mxu1 %v2818_v27  ;;  %2542 = vmatprep.subr.bf16.mxu0 %v2937_v1  ;;  %v2876_v27 = vld [vmem:[%s3529_s6 + $0x50] sm:$0xff]  }
  0x2f   : > { %2562 = vmatprep.subr.bf16.mxu1 %v2937_v1  ;;  %2556 = vmatprep.mubr.msk.bf16.mxu0 %vm2938_vm0, %v2937_v1 }
  0x30   : > { %2576 = vmatprep.mubr.msk.bf16.mxu1 %vm2938_vm0, %v2937_v1 }
  0x31   : > { %2543 = vmatpush3.bf16.msra.mxu0 %v2819_v28  ;;  %v2877_v28 = vld [vmem:[%s3529_s6 + $0x8] sm:$0xff]  }
  0x32   : > { %2563 = vmatpush3.bf16.msra.mxu1 %v2820_v29  ;;  %2544 = vmatprep.subr.bf16.mxu0 %v2937_v1  ;;  %v2878_v29 = vld [vmem:[%s3529_s6 + $0x48] sm:$0xff]  }
  0x33   : > { %2564 = vmatprep.subr.bf16.mxu1 %v2937_v1 }
  0x35   : > { %2545 = vmatpush3.bf16.msra.mxu0 %v2821_v30  ;;  %v2879_v30 = vld [vmem:[%s3529_s6] sm:$0xff]  }
  0x36   : > { %2565 = vmatpush3.bf16.msra.mxu1 %v2822_v31  ;;  %2546 = vmatprep.subr.bf16.mxu0 %v2937_v1  ;;  %v2880_v31 = vld [vmem:[%s3529_s6 + $0x40] sm:$0xff]  }
  0x37   : > { %2566 = vmatprep.subr.bf16.mxu1 %v2937_v1 }
  0x39   : > { %2547 = vmatpush3.bf16.msra.mxu0 %v2823_v32  ;;  %v2881_v32 = vld [vmem:[%s3529_s6 + $0xb8] sm:$0xff]  }
  0x3a   : > { %2567 = vmatpush3.bf16.msra.mxu1 %v2824_v33  ;;  %2548 = vmatprep.subr.bf16.mxu0 %v2937_v1  ;;  %v2882_v33 = vld [vmem:[%s3529_s6 + $0xf8] sm:$0xff]  }
  0x3b   : > { %2568 = vmatprep.subr.bf16.mxu1 %v2937_v1 }
  0x3d   : > { %2549 = vmatpush3.bf16.msra.mxu0 %v2825_v34  ;;  %v2883_v34 = vld [vmem:[%s3529_s6 + $0xb0] sm:$0xff]  }
  0x3e   : > { %2569 = vmatpush3.bf16.msra.mxu1 %v2826_v35  ;;  %2550 = vmatprep.subr.bf16.mxu0 %v2937_v1  ;;  %v2884_v35 = vld [vmem:[%s3529_s6 + $0xf0] sm:$0xff]  }
  0x3f   : > { %2570 = vmatprep.subr.bf16.mxu1 %v2937_v1 }
  0x41   : > { %2551 = vmatpush3.bf16.msra.mxu0 %v2827_v36  ;;  %v2885_v36 = vld [vmem:[%s3529_s6 + $0xa8] sm:$0xff]  }
  0x42   : > { %2571 = vmatpush3.bf16.msra.mxu1 %v2828_v37  ;;  %2552 = vmatprep.subr.bf16.mxu0 %v2937_v1  ;;  %v2886_v37 = vld [vmem:[%s3529_s6 + $0xe8] sm:$0xff]  }
  0x43   : > { %2572 = vmatprep.subr.bf16.mxu1 %v2937_v1 }
  0x45   : > { %2553 = vmatpush3.bf16.msra.mxu0 %v2829_v38  ;;  %v2887_v38 = vld [vmem:[%s3529_s6 + $0xa0] sm:$0xff]  }
  0x46   : > { %2573 = vmatpush3.bf16.msra.mxu1 %v2830_v39  ;;  %2554 = vmatprep.subr.bf16.mxu0 %v2937_v1  ;;  %v2888_v39 = vld [vmem:[%s3529_s6 + $0xe0] sm:$0xff]  }
  0x47   : > { %2574 = vmatprep.subr.bf16.mxu1 %v2937_v1 }
  0x49   : > { %2555 = vmatpush3.bf16.msra.mxu0 %v2831_v40  ;;  %v2889_v40 = vld [vmem:[%s3529_s6 + $0x98] sm:$0xff]  }
  0x4a   : > { %2575 = vmatpush3.bf16.msra.mxu1 %v2832_v41  ;;  %2580 = vmatprep.subr.bf16.mxu0 %v2937_v1  ;;  %v2890_v41 = vld [vmem:[%s3529_s6 + $0xd8] sm:$0xff]  }
  0x4b   : > { %2600 = vmatprep.subr.bf16.mxu1 %v2937_v1 }
  0x4c   : > { %2557 = vmatmul.mubr.bf16.vlgmr.msra.gmra.mxu0 %v360_v25 }
  0x4d   : > { %2577 = vmatmul.mubr.bf16.vlgmr.msra.gmra.mxu1 %v360_v25  ;;  %2581 = vmatpush3.bf16.msra.mxu0 %v2833_v42  ;;  %v2874_v25 = vld [vmem:[%s3529_s6 + $0x58] sm:$0xff]   ;;  %v2891_v42 = vld [vmem:[%s3529_s6 + $0x90] sm:$0xff]  }
  0x4e   : > { %2601 = vmatpush3.bf16.msra.mxu1 %v2834_v43  ;;  %2582 = vmatprep.subr.bf16.mxu0 %v2937_v1  ;;  %v2892_v43 = vld [vmem:[%s3529_s6 + $0xd0] sm:$0xff]  }
  0x4f   : > { %2602 = vmatprep.subr.bf16.mxu1 %v2937_v1  ;;  %2596 = vmatprep.mubr.msk.bf16.mxu0 %vm2938_vm0, %v2937_v1 }
  0x50   : > { %2616 = vmatprep.mubr.msk.bf16.mxu1 %vm2938_vm0, %v2937_v1 }
  0x51   : > { %2583 = vmatpush3.bf16.msra.mxu0 %v2835_v44  ;;  %v2893_v44 = vld [vmem:[%s3529_s6 + $0x88] sm:$0xff]  }
  0x52   : > { %2603 = vmatpush3.bf16.msra.mxu1 %v2836_v45  ;;  %2584 = vmatprep.subr.bf16.mxu0 %v2937_v1  ;;  %v2894_v45 = vld [vmem:[%s3529_s6 + $0xc8] sm:$0xff]  }
  0x53   : > { %2604 = vmatprep.subr.bf16.mxu1 %v2937_v1 }
  0x55   : > { %2585 = vmatpush3.bf16.msra.mxu0 %v2837_v46  ;;  %v2895_v46 = vld [vmem:[%s3529_s6 + $0x80] sm:$0xff]  }
  0x56   : > { %2605 = vmatpush3.bf16.msra.mxu1 %v2838_v47  ;;  %2586 = vmatprep.subr.bf16.mxu0 %v2937_v1  ;;  %v2896_v47 = vld [vmem:[%s3529_s6 + $0xc0] sm:$0xff]  }
  0x57   : > { %2606 = vmatprep.subr.bf16.mxu1 %v2937_v1 }
  0x59   : > { %2587 = vmatpush3.bf16.msra.mxu0 %v2839_v48 }
  0x5a   : > { %2607 = vmatpush3.bf16.msra.mxu1 %v2840_v49  ;;  %2588 = vmatprep.subr.bf16.mxu0 %v2937_v1 }
  0x5b   : > { %2608 = vmatprep.subr.bf16.mxu1 %v2937_v1 }
  0x5d   : > { %2589 = vmatpush3.bf16.msra.mxu0 %v2841_v50 }
  0x5e   : > { %2609 = vmatpush3.bf16.msra.mxu1 %v2842_v51  ;;  %2590 = vmatprep.subr.bf16.mxu0 %v2937_v1 }
  0x5f   : > { %2610 = vmatprep.subr.bf16.mxu1 %v2937_v1 }
  0x61   : > { %2591 = vmatpush3.bf16.msra.mxu0 %v2843_v52 }
  0x62   : > { %2611 = vmatpush3.bf16.msra.mxu1 %v2844_v53  ;;  %2592 = vmatprep.subr.bf16.mxu0 %v2937_v1 }
  0x63   : > { %2612 = vmatprep.subr.bf16.mxu1 %v2937_v1 }
  0x65   : > { %2593 = vmatpush3.bf16.msra.mxu0 %v2845_v54 }
  0x66   : > { %2613 = vmatpush3.bf16.msra.mxu1 %v2846_v55  ;;  %2594 = vmatprep.subr.bf16.mxu0 %v2937_v1 }
  0x67   : > { %2614 = vmatprep.subr.bf16.mxu1 %v2937_v1 }
  0x69   : > { %2595 = vmatpush3.bf16.msra.mxu0 %v2847_v58 }
  0x6a   : > { %2615 = vmatpush3.bf16.msra.mxu1 %v2848_v59  ;;  %2620 = vmatprep.subr.bf16.mxu0 %v2937_v1 }
  0x6b   : > { %2640 = vmatprep.subr.bf16.mxu1 %v2937_v1 }
  0x6c   : > { %2597 = vmatmul.mubr.bf16.vlgmr.msra.gmra.mxu0 %v3224_v60 }
  0x6d   : > { %2617 = vmatmul.mubr.bf16.vlgmr.msra.gmra.mxu1 %v3224_v60  ;;  %2621 = vmatpush3.bf16.msra.mxu0 %v2849_v61 }
  0x6e   : > { %2641 = vmatpush3.bf16.msra.mxu1 %v2850_v62  ;;  %2622 = vmatprep.subr.bf16.mxu0 %v2937_v1 }
  0x6f   : > { %2642 = vmatprep.subr.bf16.mxu1 %v2937_v1  ;;  %2636 = vmatprep.mubr.msk.bf16.mxu0 %vm2938_vm0, %v2937_v1 }
  0x70   : > { %2656 = vmatprep.mubr.msk.bf16.mxu1 %vm2938_vm0, %v2937_v1 }
  0x71   : > { %2623 = vmatpush3.bf16.msra.mxu0 %v2851_v63 }
  0x72   : > { %2643 = vmatpush3.bf16.msra.mxu1 %v2852_v0  ;;  %2624 = vmatprep.subr.bf16.mxu0 %v2937_v1 }
  0x73   : > { %2644 = vmatprep.subr.bf16.mxu1 %v2937_v1 }
  0x75   : > { %2625 = vmatpush3.bf16.msra.mxu0 %v2853_v2 }
  0x76   : > { %2645 = vmatpush3.bf16.msra.mxu1 %v2854_v3  ;;  %2626 = vmatprep.subr.bf16.mxu0 %v2937_v1 }
  0x77   : > { %2646 = vmatprep.subr.bf16.mxu1 %v2937_v1 }
  0x79   : > { %2627 = vmatpush3.bf16.msra.mxu0 %v2855_v4 }
  0x7a   : > { %2647 = vmatpush3.bf16.msra.mxu1 %v2856_v5  ;;  %2628 = vmatprep.subr.bf16.mxu0 %v2937_v1 }
  0x7b   : > { %2648 = vmatprep.subr.bf16.mxu1 %v2937_v1 }
  0x7d   : > { %2629 = vmatpush3.bf16.msra.mxu0 %v2857_v6 }
  0x7e   : > { %2649 = vmatpush3.bf16.msra.mxu1 %v2858_v7  ;;  %2630 = vmatprep.subr.bf16.mxu0 %v2937_v1 }
  0x7f   : > { %2650 = vmatprep.subr.bf16.mxu1 %v2937_v1 }
  0x81   : > { %2631 = vmatpush3.bf16.msra.mxu0 %v2859_v8 }
  0x82   : > { %2651 = vmatpush3.bf16.msra.mxu1 %v2860_v9  ;;  %2632 = vmatprep.subr.bf16.mxu0 %v2937_v1 }
  0x83   : > { %2652 = vmatprep.subr.bf16.mxu1 %v2937_v1 }
  0x85   : > { %2633 = vmatpush3.bf16.msra.mxu0 %v2861_v10 }
  0x86   : > { %2653 = vmatpush3.bf16.msra.mxu1 %v2862_v11  ;;  %2634 = vmatprep.subr.bf16.mxu0 %v2937_v1 }
  0x87   : > { %2654 = vmatprep.subr.bf16.mxu1 %v2937_v1 }
  0x89   : > { %2635 = vmatpush3.bf16.msra.mxu0 %v2863_v12 }
  0x8a   : > { %2655 = vmatpush3.bf16.msra.mxu1 %v2864_v13  ;;  %2660 = vmatprep.subr.bf16.mxu0 %v2937_v1 }
  0x8b   : > { %2680 = vmatprep.subr.bf16.mxu1 %v2937_v1 }
  0x8c   : > { %2637 = vmatmul.mubr.bf16.vlgmr.msra.gmra.mxu0 %v3224_v60 }
  0x8d   : > { %2657 = vmatmul.mubr.bf16.vlgmr.msra.gmra.mxu1 %v3224_v60  ;;  %2661 = vmatpush3.bf16.msra.mxu0 %v2865_v14 }
  0x8e   : > { %2681 = vmatpush3.bf16.msra.mxu1 %v2866_v15  ;;  %2662 = vmatprep.subr.bf16.mxu0 %v2937_v1 }
  0x8f   : > { %2682 = vmatprep.subr.bf16.mxu1 %v2937_v1  ;;  %2676 = vmatprep.mubr.msk.bf16.mxu0 %vm2938_vm0, %v2937_v1 }
  0x90   : > { %2696 = vmatprep.mubr.msk.bf16.mxu1 %vm2938_vm0, %v2937_v1 }
  0x91   : > { %2663 = vmatpush3.bf16.msra.mxu0 %v2867_v16 }
  0x92   : > { %2683 = vmatpush3.bf16.msra.mxu1 %v2868_v17  ;;  %2664 = vmatprep.subr.bf16.mxu0 %v2937_v1 }
  0x93   : > { %2684 = vmatprep.subr.bf16.mxu1 %v2937_v1 }
  0x95   : > { %2665 = vmatpush3.bf16.msra.mxu0 %v2869_v18 }
  0x96   : > { %2685 = vmatpush3.bf16.msra.mxu1 %v2870_v19  ;;  %2666 = vmatprep.subr.bf16.mxu0 %v2937_v1 }
  0x97   : > { %2686 = vmatprep.subr.bf16.mxu1 %v2937_v1 }
  0x99   : > { %2667 = vmatpush3.bf16.msra.mxu0 %v2871_v20 }
  0x9a   : > { %2687 = vmatpush3.bf16.msra.mxu1 %v2872_v23  ;;  %2668 = vmatprep.subr.bf16.mxu0 %v2937_v1 }
  0x9b   : > { %2688 = vmatprep.subr.bf16.mxu1 %v2937_v1 }
  0x9d   : > { %2669 = vmatpush3.bf16.msra.mxu0 %v2873_v24 }
  0x9e   : > { %2689 = vmatpush3.bf16.msra.mxu1 %v2874_v25  ;;  %2670 = vmatprep.subr.bf16.mxu0 %v2937_v1 }
  0x9f   : > { %2690 = vmatprep.subr.bf16.mxu1 %v2937_v1 }
  0xa1   : > { %2671 = vmatpush3.bf16.msra.mxu0 %v2875_v26 }
  0xa2   : > { %2691 = vmatpush3.bf16.msra.mxu1 %v2876_v27  ;;  %2672 = vmatprep.subr.bf16.mxu0 %v2937_v1 }
  0xa3   : > { %2692 = vmatprep.subr.bf16.mxu1 %v2937_v1 }
  0xa5   : > { %2673 = vmatpush3.bf16.msra.mxu0 %v2877_v28 }
  0xa6   : > { %2693 = vmatpush3.bf16.msra.mxu1 %v2878_v29  ;;  %2674 = vmatprep.subr.bf16.mxu0 %v2937_v1 }
  0xa7   : > { %2694 = vmatprep.subr.bf16.mxu1 %v2937_v1 }
  0xa9   : > { %2675 = vmatpush3.bf16.msra.mxu0 %v2879_v30 }
  0xaa   : > { %2695 = vmatpush3.bf16.msra.mxu1 %v2880_v31  ;;  %2700 = vmatprep.subr.bf16.mxu0 %v2937_v1 }
  0xab   : > { %2720 = vmatprep.subr.bf16.mxu1 %v2937_v1 }
  0xac   : > { %2677 = vmatmul.mubr.bf16.vlgmr.msra.gmra.mxu0 %v3224_v60 }
  0xad   : > { %2697 = vmatmul.mubr.bf16.vlgmr.msra.gmra.mxu1 %v3224_v60  ;;  %2701 = vmatpush3.bf16.msra.mxu0 %v2881_v32 }
  0xae   : > { %2721 = vmatpush3.bf16.msra.mxu1 %v2882_v33  ;;  %2702 = vmatprep.subr.bf16.mxu0 %v2937_v1 }
  0xaf   : > { %2722 = vmatprep.subr.bf16.mxu1 %v2937_v1  ;;  %2716 = vmatprep.mubr.msk.bf16.mxu0 %vm2938_vm0, %v2937_v1 }
  0xb0   : > { %2736 = vmatprep.mubr.msk.bf16.mxu1 %vm2938_vm0, %v2937_v1 }
  0xb1   : > { %2703 = vmatpush3.bf16.msra.mxu0 %v2883_v34 }
  0xb2   : > { %2723 = vmatpush3.bf16.msra.mxu1 %v2884_v35  ;;  %2704 = vmatprep.subr.bf16.mxu0 %v2937_v1 }
  0xb3   : > { %2724 = vmatprep.subr.bf16.mxu1 %v2937_v1 }
  0xb5   : > { %2705 = vmatpush3.bf16.msra.mxu0 %v2885_v36 }
  0xb6   : > { %2725 = vmatpush3.bf16.msra.mxu1 %v2886_v37  ;;  %2706 = vmatprep.subr.bf16.mxu0 %v2937_v1 }
  0xb7   : > { %2726 = vmatprep.subr.bf16.mxu1 %v2937_v1 }
  0xb9   : > { %2707 = vmatpush3.bf16.msra.mxu0 %v2887_v38 }
  0xba   : > { %2727 = vmatpush3.bf16.msra.mxu1 %v2888_v39  ;;  %2708 = vmatprep.subr.bf16.mxu0 %v2937_v1 }
  0xbb   : > { %2728 = vmatprep.subr.bf16.mxu1 %v2937_v1 }
  0xbd   : > { %2709 = vmatpush3.bf16.msra.mxu0 %v2889_v40 }
  0xbe   : > { %2729 = vmatpush3.bf16.msra.mxu1 %v2890_v41  ;;  %2710 = vmatprep.subr.bf16.mxu0 %v2937_v1 }
  0xbf   : > { %2730 = vmatprep.subr.bf16.mxu1 %v2937_v1 }
  0xc1   : > { %2711 = vmatpush3.bf16.msra.mxu0 %v2891_v42 }
  0xc2   : > { %2731 = vmatpush3.bf16.msra.mxu1 %v2892_v43  ;;  %2712 = vmatprep.subr.bf16.mxu0 %v2937_v1 }
  0xc3   : > { %2732 = vmatprep.subr.bf16.mxu1 %v2937_v1 }
  0xc5   : > { %2713 = vmatpush3.bf16.msra.mxu0 %v2893_v44 }
  0xc6   : > { %2733 = vmatpush3.bf16.msra.mxu1 %v2894_v45  ;;  %2714 = vmatprep.subr.bf16.mxu0 %v2937_v1 }
  0xc7   : > { %2734 = vmatprep.subr.bf16.mxu1 %v2937_v1 }
  0xc9   : > { %2715 = vmatpush3.bf16.msra.mxu0 %v2895_v46 }
  0xca   : > { %2735 = vmatpush3.bf16.msra.mxu1 %v2896_v47  ;;  %2740 = vmatprep.subr.bf16.mxu0 %v2937_v1 }
  0xcb   : > { %2746 = vmatprep.subr.bf16.mxu1 %v2937_v1 }
  0xcc   : > { %2717 = vmatmul.mubr.bf16.vlgmr.msra.gmra.mxu0 %v3224_v60 }
  0xcd   : > { %2737 = vmatmul.mubr.bf16.vlgmr.msra.gmra.mxu1 %v3224_v60  ;;  %2742 = vmatprep.mubr.msk.bf16.mxu0 %vm2938_vm0, %v2937_v1 }
  0xce   : > { %2748 = vmatprep.mubr.msk.bf16.mxu1 %vm2938_vm0, %v2937_v1 }
  0xec   : > { %v508_v48 = vpop.f32.mrf.mxu0 }
  0xed   : > { %v597_v49 = vpop.f32.mrf.mxu1 }
  0xee   : > { %v2518_v50 = vpop.f32.mrf.mxu0 }
  0xef   : > { %v2538_v51 = vpop.f32.mrf.mxu1 }
  0xf0   : > { %v511_v52 = vpop.f32.mrf.mxu0 }
  0xf1   : > { %v1622_v53 = vpack.c.bf16 %v511_v52, %v508_v48  ;;  %v600_v54 = vpop.f32.mrf.mxu1 }
  0xf2   : > { %v1623_v55 = vpack.c.bf16 %v600_v54, %v597_v49  ;;  %v2519_v56 = vpop.f32.mrf.mxu0 }
  0xf3   : > { %v2539_v57 = vpop.f32.mrf.mxu1 }
 0x10c   : > { %v686_v58 = vpop.f32.mrf.mxu0 }
 0x10d   : > { %v775_v59 = vpop.f32.mrf.mxu1 }
 0x10e   : > { %v2558_v61 = vpop.f32.mrf.mxu0 }
 0x10f   : > { %v2578_v60 = vpop.f32.mrf.mxu1 }
 0x110   : > { %v689_v62 = vpop.f32.mrf.mxu0 }
 0x111   : > { %v1624_v63 = vpack.c.bf16 %v689_v62, %v686_v58  ;;  %v778_v0 = vpop.f32.mrf.mxu1 }
 0x112   : > { %v1625_v2 = vpack.c.bf16 %v778_v0, %v775_v59  ;;  %v2559_v3 = vpop.f32.mrf.mxu0 }
 0x113   : > { %v2579_v4 = vpop.f32.mrf.mxu1 }
 0x12c   : > { %v928_v5 = vpop.f32.mrf.mxu0 }
 0x12d   : > { %v1017_v6 = vpop.f32.mrf.mxu1 }
 0x12e   : > { %v2598_v7 = vpop.f32.mrf.mxu0 }
 0x12f   : > { %v2618_v8 = vpop.f32.mrf.mxu1 }
 0x130   : > { %v931_v9 = vpop.f32.mrf.mxu0 }
 0x131   : > { %v1626_v10 = vpack.c.bf16 %v931_v9, %v928_v5  ;;  %v1020_v11 = vpop.f32.mrf.mxu1 }
 0x132   : > { %v1627_v12 = vpack.c.bf16 %v1020_v11, %v1017_v6  ;;  %v2599_v13 = vpop.f32.mrf.mxu0 }
 0x133   : > { %v1635_v14 = vsel %vm1630_vm1, %v1626_v10, 0  ;;  %v2619_v15 = vpop.f32.mrf.mxu1 }
 0x134   : > { %v1682_v16 = vsel %vm1630_vm1, %v1627_v12, 0  ;;  %2741 = vmatpush3.bf16.xpose.msra.mxu0 %v1635_v14 }
 0x135   : > { %2747 = vmatpush3.bf16.xpose.msra.mxu1 %v1682_v16  ;;  %2752 = vmatprep.subr.bf16.mxu0 %v2937_v1 }
 0x136   : > { %2758 = vmatprep.subr.bf16.mxu1 %v2937_v1 }
 0x13b   : > { %2743 = vmatmul.mubr.msk.bf16.vlgmr.msra.gmra.mxu0 %vm1630_vm1, %v1622_v53 }
 0x13c   : > { %2749 = vmatmul.mubr.msk.bf16.vlgmr.msra.gmra.mxu1 %vm1630_vm1, %v1623_v55  ;;  %2754 = vmatprep.mubr.msk.bf16.mxu0 %vm2938_vm0, %v2937_v1 }
 0x13d   : > { %2760 = vmatprep.mubr.msk.bf16.mxu1 %vm2938_vm0, %v2937_v1 }
 0x14c   : > { %v1106_v17 = vpop.f32.mrf.mxu0 }
 0x14d   : > { %v1195_v18 = vpop.f32.mrf.mxu1 }
 0x14e   : > { %v2638_v19 = vpop.f32.mrf.mxu0 }
 0x14f   : > { %v2658_v20 = vpop.f32.mrf.mxu1 }
 0x150   : > { %v1109_v23 = vpop.f32.mrf.mxu0 }
 0x151   : > { %v1628_v24 = vpack.c.bf16 %v1109_v23, %v1106_v17  ;;  %v1198_v25 = vpop.f32.mrf.mxu1 }
 0x152   : > { %v1629_v26 = vpack.c.bf16 %v1198_v25, %v1195_v18  ;;  %v2639_v27 = vpop.f32.mrf.mxu0 }
 0x153   : > { %v1729_v28 = vsel %vm1630_vm1, %v1628_v24, 0  ;;  %v2659_v29 = vpop.f32.mrf.mxu1 }
 0x154   : > { %v1776_v30 = vsel %vm1630_vm1, %v1629_v26, 0  ;;  %2753 = vmatpush3.bf16.xpose.msra.mxu0 %v1729_v28 }
 0x155   : > { %2759 = vmatpush3.bf16.xpose.msra.mxu1 %v1776_v30  ;;  %2764 = vmatprep.subr.bf16.mxu0 %v2937_v1 }
 0x156   : > { %2770 = vmatprep.subr.bf16.mxu1 %v2937_v1 }
 0x15b   : > { %2755 = vmatmul.mubr.msk.bf16.vlgmr.msra.gmra.mxu0 %vm1630_vm1, %v1624_v63 }
 0x15c   : > { %2761 = vmatmul.mubr.msk.bf16.vlgmr.msra.gmra.mxu1 %vm1630_vm1, %v1625_v2  ;;  %2766 = vmatprep.mubr.msk.bf16.mxu0 %vm2938_vm0, %v2937_v1 }
 0x15d   : > { %2772 = vmatprep.mubr.msk.bf16.mxu1 %vm2938_vm0, %v2937_v1 }
 0x16c   : > { %v1348_v31 = vpop.f32.mrf.mxu0 }
 0x16d   : > { %v1437_v32 = vpop.f32.mrf.mxu1 }
 0x16e   : > { %v2678_v33 = vpop.f32.mrf.mxu0 }
 0x16f   : > { %v2698_v34 = vpop.f32.mrf.mxu1 }
 0x170   : > { %v1351_v35 = vpop.f32.mrf.mxu0 }
 0x171   : > { %v1920_v36 = vpack.c.bf16 %v1351_v35, %v1348_v31  ;;  %v1440_v37 = vpop.f32.mrf.mxu1 }
 0x172   : > { %v2679_v38 = vpop.f32.mrf.mxu0  ;;  %v1921_v39 = vpack.c.bf16 %v1440_v37, %v1437_v32 }
 0x173   : > { %2765 = vmatpush3.bf16.msra.mxu0 %v1920_v36  ;;  %v2699_v40 = vpop.f32.mrf.mxu1 }
 0x174   : > { %2771 = vmatpush3.bf16.msra.mxu1 %v1921_v39  ;;  %2776 = vmatprep.subr.bf16.mxu0 %v2937_v1 }
 0x175   : > { %2782 = vmatprep.subr.bf16.mxu1 %v2937_v1 }
 0x18c   : > { %v3466_v41 = vpop.f32.mrf.mxu0 }
 0x18d   : > { %v3468_v42 = vpop.f32.mrf.mxu1 }
 0x18e   : > { %v2718_v43 = vpop.f32.mrf.mxu0 }
 0x18f   : > { %v2738_v44 = vpop.f32.mrf.mxu1 }
 0x190   : > { %v3470_v45 = vpop.f32.mrf.mxu0 }
 0x191   : > { %v1922_v46 = vpack.c.bf16 %v3470_v45, %v3466_v41  ;;  %v3474_v47 = vpop.f32.mrf.mxu1 }
 0x192   : > { %v1923_v48 = vpack.c.bf16 %v3474_v47, %v3468_v42  ;;  %v2719_v49 = vpop.f32.mrf.mxu0 }
 0x193   : > { %v2739_v50 = vpop.f32.mrf.mxu1 }
 0x1fb   : > { %v1671_v51 = vpop.f32.mrf.mxu0 }
 0x1fc   : > { %v1819_v52 = vmul.f32 0.17677669, %v1671_v51  ;;  %v1718_v53 = vpop.f32.mrf.mxu1 }
 0x1fd   : > { %v1821_v54 = vmul.f32 0.17677669, %v1718_v53  ;;  %v2744_v55 = vpop.f32.mrf.mxu0 }
 0x1fe   : > { %v2750_v56 = vpop.f32.mrf.mxu1  ;;  %v1828_v57 = vsel %vm1827_vm2, %v1819_v52, -inf }
 0x1ff   : > { %v1834_v58 = vsel %vm1827_vm2, %v1821_v54, -inf  ;;  %1829 = vmax.xlane.f32.xlu0 %v1828_v57  ;;  %v1674_v59 = vpop.f32.mrf.mxu0 }
 0x200   : > { %1835 = vmax.xlane.f32.xlu1 %v1834_v58  ;;  %v1721_v61 = vpop.f32.mrf.mxu1  ;;  %v1820_v60 = vmul.f32 0.17677669, %v1674_v59 }
 0x201   : > { %v1822_v62 = vmul.f32 0.17677669, %v1721_v61  ;;  %v2745_v63 = vpop.f32.mrf.mxu0 }
 0x202   : > { %v2751_v0 = vpop.f32.mrf.mxu1  ;;  %v1831_v2 = vsel %vm1827_vm2, %v1820_v60, -inf }
 0x203   : > { %v1837_v3 = vsel %vm1827_vm2, %v1822_v62, -inf  ;;  %1832 = vmax.xlane.f32.xlu0 %v1831_v2 }
 0x204   : > { %1838 = vmax.xlane.f32.xlu1 %v1837_v3 }
 0x21b   : > { %v1765_v4 = vpop.f32.mrf.mxu0 }
 0x21c   : > { %v1823_v5 = vmul.f32 0.17677669, %v1765_v4  ;;  %v1812_v6 = vpop.f32.mrf.mxu1 }
 0x21d   : > { %v2756_v7 = vpop.f32.mrf.mxu0  ;;  %v1825_v8 = vmul.f32 0.17677669, %v1812_v6 }
 0x21e   : > { %v2762_v9 = vpop.f32.mrf.mxu1  ;;  %v1840_v10 = vsel %vm1827_vm2, %v1823_v5, -inf }
 0x21f   : > { %1841 = vmax.xlane.f32.xlu0 %v1840_v10  ;;  %v1768_v11 = vpop.f32.mrf.mxu0  ;;  %v1846_v17 = vsel %vm1827_vm2, %v1825_v8, -inf }
 0x220   : > { %v1815_v12 = vpop.f32.mrf.mxu1  ;;  %v1824_v13 = vmul.f32 0.17677669, %v1768_v11 }
 0x221   : > { %v2757_v14 = vpop.f32.mrf.mxu0  ;;  %v1826_v15 = vmul.f32 0.17677669, %v1815_v12 }
 0x222   : > { %v2763_v16 = vpop.f32.mrf.mxu1  ;;  %v1843_v18 = vsel %vm1827_vm2, %v1824_v13, -inf }
 0x223   : > { %1847 = vmax.xlane.f32.xlu0 %v1846_v17  ;;  %1844 = vmax.xlane.f32.xlu1 %v1843_v18  ;;  %v1849_v19 = vsel %vm1827_vm2, %v1826_v15, -inf }
 0x227   : > { %1850 = vmax.xlane.f32.xlu1 %v1849_v19 }
 0x288   : > { %v1830_v20 = vpop.xlane.xlu0 %1829 }
 0x289   : > { %v1836_v23 = vpop.xlane.xlu1 %1835  ;;  %v1852_v24 = vsub.f32 %v1819_v52, %v1830_v20 }
 0x28a   : > { %v1854_v25 = vsub.f32 %v1821_v54, %v1836_v23 }
 0x28b   : > { %v1860_v26 = vmul.f32 1.442695, %v1852_v24 }
 0x28c   : > { %v1864_v27 = vmul.f32 1.442695, %v1854_v25  ;;  %v1833_v28 = vpop.xlane.xlu0 %1832 }
 0x28d   : > { %2897 = vpow2.f32 %v1860_v26  ;;  %v1839_v29 = vpop.xlane.xlu1 %1838  ;;  %v1853_v30 = vsub.f32 %v1820_v60, %v1833_v28 }
 0x28e   : > { %v1855_v31 = vsub.f32 %v1822_v62, %v1839_v29  ;;  %2899 = vpow2.f32 %v1864_v27 }
 0x28f   : > { %v1862_v32 = vmul.f32 1.442695, %v1853_v30 }
 0x290   : > { %v1866_v33 = vmul.f32 1.442695, %v1855_v31 }
 0x291   : > { %2901 = vpow2.f32 %v1862_v32 }
 0x292   : > { %2903 = vpow2.f32 %v1866_v33 }
 0x29a   : > { %v2898_v34 = vpop.eup %2897 }
 0x29b   : > { %v1876_v35 = vsel %vm1827_vm2, %v2898_v34, 0.0  ;;  %v2900_v36 = vpop.eup %2899 }
 0x29c   : > { %1877 = vadd.xlane.f32.xlu0 %v1876_v35  ;;  %v1882_v38 = vsel %vm1827_vm2, %v2900_v36, 0.0 }
 0x29e   : > { %v2902_v37 = vpop.eup %2901 }
 0x29f   : > { %v1879_v39 = vsel %vm1827_vm2, %v2902_v37, 0.0  ;;  %v2904_v40 = vpop.eup %2903 }
 0x2a0   : > { %1883 = vadd.xlane.f32.xlu0 %v1882_v38  ;;  %1880 = vadd.xlane.f32.xlu1 %v1879_v39  ;;  %v1885_v43 = vsel %vm1827_vm2, %v2904_v40, 0.0 }
 0x2a4   : > { %1886 = vadd.xlane.f32.xlu1 %v1885_v43 }
 0x2a8   : > { %v1842_v44 = vpop.xlane.xlu0 %1841 }
 0x2a9   : > { %v1856_v49 = vsub.f32 %v1823_v5, %v1842_v44 }
 0x2ab   : > { %v1868_v50 = vmul.f32 1.442695, %v1856_v49 }
 0x2ac   : > { %v1848_v51 = vpop.xlane.xlu0 %1847  ;;  %v1845_v52 = vpop.xlane.xlu1 %1844 }
 0x2ad   : > { %2905 = vpow2.f32 %v1868_v50  ;;  %v1858_v53 = vsub.f32 %v1825_v8, %v1848_v51  ;;  %v1857_v54 = vsub.f32 %v1824_v13, %v1845_v52 }
 0x2af   : > { %v1872_v55 = vmul.f32 1.442695, %v1858_v53  ;;  %v1870_v56 = vmul.f32 1.442695, %v1857_v54 }
 0x2b0   : > { %v1851_v57 = vpop.xlane.xlu1 %1850 }
 0x2b1   : > { %2907 = vpow2.f32 %v1872_v55  ;;  %v1859_v58 = vsub.f32 %v1826_v15, %v1851_v57 }
 0x2b2   : > { %2909 = vpow2.f32 %v1870_v56 }
 0x2b3   : > { %v1874_v59 = vmul.f32 1.442695, %v1859_v58 }
 0x2b5   : > { %2911 = vpow2.f32 %v1874_v59 }
 0x2ba   : > { %v2906_v61 = vpop.eup %2905 }
 0x2bb   : > { %v1888_v60 = vsel %vm1827_vm2, %v2906_v61, 0.0 }
 0x2bc   : > { %1889 = vadd.xlane.f32.xlu0 %v1888_v60 }
 0x2be   : > { %v2908_v62 = vpop.eup %2907 }
 0x2bf   : > { %v2910_v63 = vpop.eup %2909  ;;  %v1894_v0 = vsel %vm1827_vm2, %v2908_v62, 0.0 }
 0x2c0   : > { %1895 = vadd.xlane.f32.xlu0 %v1894_v0  ;;  %v1891_v2 = vsel %vm1827_vm2, %v2910_v63, 0.0 }
 0x2c1   : > { %1892 = vadd.xlane.f32.xlu1 %v1891_v2 }
 0x2c2   : > { %v2912_v3 = vpop.eup %2911 }
 0x2c3   : > { %v1897_v4 = vsel %vm1827_vm2, %v2912_v3, 0.0 }
 0x2c5   : > { %1898 = vadd.xlane.f32.xlu1 %v1897_v4 }
 0x325   : > { %v1878_v5 = vpop.xlane.xlu0 %1877 }
 0x326   : > { %2913 = vrcp.f32 %v1878_v5 }
 0x329   : > { %v1884_v6 = vpop.xlane.xlu0 %1883  ;;  %v1881_v7 = vpop.xlane.xlu1 %1880 }
 0x32a   : > { %2915 = vrcp.f32 %v1881_v7 }
 0x32b   : > { %2917 = vrcp.f32 %v1884_v6 }
 0x32d   : > { %v1887_v8 = vpop.xlane.xlu1 %1886 }
 0x32e   : > { %2919 = vrcp.f32 %v1887_v8 }
 0x333   : > { %v2914_v9 = vpop.eup %2913 }
 0x334   : > { %v1908_v12 = vmul.f32 %v2914_v9, %v2898_v34 }
 0x337   : > { %v2916_v10 = vpop.eup %2915 }
 0x338   : > { %v2918_v11 = vpop.eup %2917  ;;  %v1909_v13 = vmul.f32 %v2916_v10, %v2902_v37 }
 0x339   : > { %v1910_v16 = vmul.f32 %v2918_v11, %v2900_v36 }
 0x33a   : > { %v1916_v15 = vpack.c.bf16 %v1909_v13, %v1908_v12 }
 0x33b   : > { %v2920_v14 = vpop.eup %2919 }
 0x33c   : > { %v1911_v17 = vmul.f32 %v2920_v14, %v2904_v40  ;;  %2767 = vmatmul.mubr.msk.bf16.vlgmr.msra.gmra.mxu0 %vm1827_vm2, %v1916_v15 }
 0x33d   : > { %2777 = vmatpush3.bf16.msra.mxu0 %v1922_v46  ;;  %2778 = vmatprep.mubr.msk.bf16.mxu0 %vm2938_vm0, %v2937_v1 }
 0x33e   : > { %v1917_v18 = vpack.c.bf16 %v1911_v17, %v1910_v16 }
 0x340   : > { %2773 = vmatmul.mubr.msk.bf16.vlgmr.msra.gmra.mxu1 %vm1827_vm2, %v1917_v18 }
 0x341   : > { %2783 = vmatpush3.bf16.msra.mxu1 %v1923_v48  ;;  %2784 = vmatprep.mubr.msk.bf16.mxu1 %vm2938_vm0, %v2937_v1 }
 0x345   : > { %v1890_v19 = vpop.xlane.xlu0 %1889 }
 0x346   : > { %2921 = vrcp.f32 %v1890_v19 }
 0x349   : > { %v1896_v20 = vpop.xlane.xlu0 %1895 }
 0x34a   : > { %v1893_v23 = vpop.xlane.xlu1 %1892 }
 0x34b   : > { %2923 = vrcp.f32 %v1893_v23 }
 0x34c   : > { %2925 = vrcp.f32 %v1896_v20 }
 0x34e   : > { %v1899_v41 = vpop.xlane.xlu1 %1898 }
 0x34f   : > { %2927 = vrcp.f32 %v1899_v41 }
 0x353   : > { %v2922_v45 = vpop.eup %2921 }
 0x354   : > { %v1912_v24 = vmul.f32 %v2922_v45, %v2906_v61 }
 0x358   : > { %v2924_v46 = vpop.eup %2923 }
 0x359   : > { %v1913_v25 = vmul.f32 %v2924_v46, %v2910_v63  ;;  %v2926_v26 = vpop.eup %2925 }
 0x35a   : > { %v1914_v42 = vmul.f32 %v2926_v26, %v2908_v62 }
 0x35b   : > { %v1918_v27 = vpack.c.bf16 %v1913_v25, %v1912_v24 }
 0x35c   : > { %v2928_v28 = vpop.eup %2927 }
 0x35d   : > { %2779 = vmatmul.mubr.msk.bf16.vlgmr.msra.gmra.mxu0 %vm1827_vm2, %v1918_v27  ;;  %v1915_v47 = vmul.f32 %v2928_v28, %v2912_v3 }
 0x35f   : > { %v1919_v1 = vpack.c.bf16 %v1915_v47, %v1914_v42 }
 0x361   : > { %2785 = vmatmul.mubr.msk.bf16.vlgmr.msra.gmra.mxu1 %vm1827_vm2, %v1919_v1 }
 0x3fc   : > { %v1961_v48 = vpop.f32.mrf.mxu0 }
 0x3fe   : > { %v2768_v29 = vpop.f32.mrf.mxu0 }
 0x400   : > { %v2005_v30 = vpop.f32.mrf.mxu1  ;;  %v1964_v31 = vpop.f32.mrf.mxu0 }
 0x401   : > { %2102 = vrot.lane.b32.xlu0 %v2005_v30, %s2939_s19 }
 0x402   : > { %v2774_v32 = vpop.f32.mrf.mxu1  ;;  %v2769_v33 = vpop.f32.mrf.mxu0 }
 0x404   : > { %v2008_v34 = vpop.f32.mrf.mxu1 }
 0x405   : > { %2104 = vrot.lane.b32.xlu1 %v2008_v34, %s2939_s19 }
 0x406   : > { %v2775_v35 = vpop.f32.mrf.mxu1 }
 0x41d   : > { %v2049_v36 = vpop.f32.mrf.mxu0 }
 0x41e   : > { %2110 = vrot.lane.b32.xlu1 %v2049_v36, %s2940_s20 }
 0x41f   : > { %v2780_v37 = vpop.f32.mrf.mxu0 }
 0x421   : > { %v2052_v38 = vpop.f32.mrf.mxu0  ;;  %v2093_v39 = vpop.f32.mrf.mxu1 }
 0x422   : > { %2118 = vrot.lane.b32.xlu0 %v2093_v39, %s2941_s21  ;;  %2112 = vrot.lane.b32.xlu1 %v2052_v38, %s2940_s20 }
 0x423   : > { %v2781_v40 = vpop.f32.mrf.mxu0  ;;  %v2786_v43 = vpop.f32.mrf.mxu1 }
 0x425   : > { %v2096_v44 = vpop.f32.mrf.mxu1 }
 0x426   : > { %2120 = vrot.lane.b32.xlu1 %v2096_v44, %s2941_s21 }
 0x427   : > { %v2787_v49 = vpop.f32.mrf.mxu1 }
 0x473   : > { %v2103_v51 = vpop.permute.xlu0 %2102 }
 0x474   : > { %v2124_v53 = vsel %vm1630_vm1, %v1961_v48, %v2103_v51 }
 0x477   : > { %v2105_v50 = vpop.permute.xlu1 %2104 }
 0x478   : > { %v2125_v59 = vsel %vm1630_vm1, %v1964_v31, %v2105_v50 }
 0x490   : > { %v2111_v52 = vpop.permute.xlu1 %2110 }
 0x491   : > { %v2127_v54 = vsel %vm2126_vm3, %v2124_v53, %v2111_v52 }
 0x494   : > { %v2119_v55 = vpop.permute.xlu0 %2118  ;;  %v2113_v56 = vpop.permute.xlu1 %2112 }
 0x495   : > { %v2130_v57 = vsel %vm2129_vm4, %v2127_v54, %v2119_v55  ;;  %v2128_v61 = vsel %vm2126_vm3, %v2125_v59, %v2113_v56 }
 0x496   : > { %v2132_v58 = vadd.f32 %v2130_v57, %v3070_v21 }
 0x498   : > { %2134 = vst [vmem:[%s332_s25] sm:$0xff] %v2132_v58  ;;  %v2121_v60 = vpop.permute.xlu1 %2120  ;;  %v2143_v0 = vmul.f32 %v2132_v58, %v2132_v58 }
 0x499   : > { %v2131_v62 = vsel %vm2129_vm4, %v2128_v61, %v2121_v60 }
 0x49a   : > { %v2133_v63 = vadd.f32 %v2131_v62, %v3072_v22 }
 0x49c   : > { %2135 = vst [vmem:[%s332_s25 + $0x8] sm:$0xff] %v2133_v63  ;;  %v2136_v2 = vadd.f32 %v2133_v63, %v2132_v58  ;;  %v2144_v3 = vmul.f32 %v2133_v63, %v2133_v63 }
 0x49e   : > { %v2137_v4 = vrot.slane %v2136_v2, 4  ;;  %v2145_v5 = vadd.f32 %v2144_v3, %v2143_v0 }
 0x4a0   : > { %v2138_v6 = vadd.f32 %v2137_v4, %v2136_v2  ;;  %v2146_v7 = vrot.slane %v2145_v5, 4 }
 0x4a2   : > { %v2139_v8 = vrot.slane %v2138_v6, 2  ;;  %v2147_v9 = vadd.f32 %v2146_v7, %v2145_v5 }
 0x4a4   : > { %v2140_v21 = vadd.f32 %v2139_v8, %v2138_v6  ;;  %v2148_v10 = vrot.slane %v2147_v9, 2 }
 0x4a6   : > { %v2141_v11 = vrot.slane %v2140_v21, 1  ;;  %v2149_v12 = vadd.f32 %v2148_v10, %v2147_v9 }
 0x4a8   : > { %v2150_v13 = vrot.slane %v2149_v12, 1  ;;  %v2142_v22 = vadd.f32 %v2141_v11, %v2140_v21 }
 0x4aa   : > { %v2151_v14 = vadd.f32 %v2150_v13, %v2149_v12 }
 0x4ac   : > { %v2153_v15 = vsel %vm2152_vm5, %v2142_v22, %v2151_v14 }
 0x4ad   : > { %2154 = vst [vmem:[%s336_s30] sm:$0x3] %v2153_v15 }
 0x4ae PF: > { %s19_s27 = sadd.s32 1, %s2935_s27  }
 0x4af   : > { %p16_p4 = scmp.ge.s32.totalorder %s19_s27, 4  }
 0x4b1   :  { %18 = sbr.rel (!%p16_p4) target bundleno = 1 (0x1), region = 93 }

</bundles_post_ra>
